<compile_context>
chip_gen: v5e
topology: v5e:2x2
jax: 0.10.0
libtpu: 0.0.40
codegen_flags: <defaults>
</compile_context>

<pallas_src>
import functools

import jax
import jax.numpy as jnp
from jax import lax
from jax.experimental import pallas as pl
from jax.experimental.pallas import tpu as pltpu


# ----------------------------------------------------------------------------
# Fused kernel builder
# ----------------------------------------------------------------------------
def _build_fused_rnn_kernel(num_layers, T, B, D, H, O):
    """Kernel refs layout:
       inputs : x_flat (T*B, D),
                [w_in_l (D_l, 4H), w_hh_l (H, 4H), b_l (1, 4H)] * num_layers,
                w_fc (H, O), b_fc (1, O)
       output : out (B, O)
       scratch: gx_s (T*B, 4H), hseq_s (T*B, H), h_s (B, H), c_s (B, H)
    """
    G = 4 * H
    unrolled = T <= 64  # fully unroll short sequences (static indexing)

    def kernel(*refs):
        x_ref = refs[0]
        layer_refs = []
        i = 1
        for _ in range(num_layers):
            layer_refs.append((refs[i], refs[i + 1], refs[i + 2]))
            i += 3
        w_fc_ref, b_fc_ref = refs[i], refs[i + 1]
        out_ref = refs[i + 2]
        gx_s, hseq_s, h_s, c_s = refs[i + 3:i + 7]

        for l, (w_in_ref, w_hh_ref, b_ref) in enumerate(layer_refs):
            # ---- hoisted, time-parallel input projection (one big MXU matmul)
            inp = x_ref[...] if l == 0 else hseq_s[...]          # (T*B, D_l)
            gx_s[...] = (
                jnp.dot(inp, w_in_ref[...], preferred_element_type=jnp.float32)
                + b_ref[...]
            )                                                     # (T*B, 4H)

            w_hh = w_hh_ref[...]   # hoisted: loaded once per layer
            h_s[...] = jnp.zeros((B, H), jnp.float32)
            c_s[...] = jnp.zeros((B, H), jnp.float32)
            write_seq = l < num_layers - 1

            def step(t, _w_hh=w_hh, _write_seq=write_seq):
                rows = pl.ds(t * B, B)
                gates = gx_s[rows, :] + jnp.dot(
                    h_s[...], _w_hh, preferred_element_type=jnp.float32)
                i_g = jax.nn.sigmoid(gates[:, 0 * H:1 * H])
                f_g = jax.nn.sigmoid(gates[:, 1 * H:2 * H])
                g_g = jnp.tanh(gates[:, 2 * H:3 * H])
                o_g = jax.nn.sigmoid(gates[:, 3 * H:4 * H])
                c_new = f_g * c_s[...] + i_g * g_g
                h_new = o_g * jnp.tanh(c_new)
                c_s[...] = c_new
                h_s[...] = h_new
                if _write_seq:
                    hseq_s[rows, :] = h_new

            if unrolled:
                for t in range(T):
                    step(t)
            else:
                def fori_body(t, carry):
                    step(t)
                    return carry
                lax.fori_loop(0, T, fori_body, 0)

        # ---- fused FC on the last timestep's hidden state of the last layer
        out_ref[...] = (
            jnp.dot(h_s[...], w_fc_ref[...], preferred_element_type=jnp.float32)
            + b_fc_ref[...]
        ).astype(out_ref.dtype)

    return kernel


# ----------------------------------------------------------------------------
# Public forward (matches RNNModel.forward in eval mode)
# ----------------------------------------------------------------------------
@jax.jit
def rnn_model_forward(x_btd, params):
    """x_btd: (B, T, input_size) batch-first (like nn.LSTM(batch_first=True)).
    Returns (B, output_size)."""
    lstm_params = params["lstm"]
    w_fc, b_fc = params["fc"]
    B, T, D = x_btd.shape
    H = lstm_params[0][1].shape[1]          # w_hh: (4H, H)
    O = w_fc.shape[0]

    # Flatten once to time-major (T*B, D); tiny relayout handled by XLA.
    x_flat = jnp.transpose(x_btd.astype(jnp.float32), (1, 0, 2)).reshape(T * B, D)

    inputs = [x_flat]
    for (w_ih, w_hh, b_ih, b_hh) in lstm_params:
        inputs.append(jnp.asarray(w_ih, jnp.float32).T)                 # (D_l, 4H)
        inputs.append(jnp.asarray(w_hh, jnp.float32).T)                 # (H, 4H)
        inputs.append((b_ih + b_hh).astype(jnp.float32)[None, :])       # (1, 4H)
    inputs.append(jnp.asarray(w_fc, jnp.float32).T)                     # (H, O)
    inputs.append(jnp.asarray(b_fc, jnp.float32)[None, :])              # (1, O)

    kernel = _build_fused_rnn_kernel(len(lstm_params), T, B, D, H, O)

    return pl.pallas_call(
        kernel,
        out_shape=jax.ShapeDtypeStruct((B, O), jnp.float32),
        in_specs=[pl.BlockSpec(memory_space=pltpu.VMEM)] * len(inputs),
        out_specs=pl.BlockSpec(memory_space=pltpu.VMEM),
        scratch_shapes=[
            pltpu.VMEM((T * B, 4 * H), jnp.float32),  # gx_s: hoisted gate inputs
            pltpu.VMEM((T * B, H), jnp.float32),      # hseq_s: per-layer hidden seq
            pltpu.VMEM((B, H), jnp.float32),          # h state
            pltpu.VMEM((B, H), jnp.float32),          # c state
        ],
    )(*inputs)


# ----------------------------------------------------------------------------
# Pure-JAX reference (for verification)
# ----------------------------------------------------------------------------
def rnn_model_reference(x_btd, params):
    h_seq = jnp.transpose(x_btd, (1, 0, 2)).astype(jnp.float32)  # (T, B, D)
    T, B, _ = h_seq.shape
    for (w_ih, w_hh, b_ih, b_hh) in params["lstm"]:
        H = w_hh.shape[1]
        h = jnp.zeros((B, H), jnp.float32)
        c = jnp.zeros((B, H), jnp.float32)
        outs = []
        for t in range(T):
            gates = h_seq[t] @ w_ih.T + h @ w_hh.T + b_ih + b_hh
            i_g = jax.nn.sigmoid(gates[:, 0 * H:1 * H])
            f_g = jax.nn.sigmoid(gates[:, 1 * H:2 * H])
            g_g = jnp.tanh(gates[:, 2 * H:3 * H])
            o_g = jax.nn.sigmoid(gates[:, 3 * H:4 * H])
            c = f_g * c + i_g * g_g
            h = o_g * jnp.tanh(c)
            outs.append(h)
        h_seq = jnp.stack(outs, axis=0)
    last = h_seq[-1]
    w_fc, b_fc = params["fc"]
    return last @ w_fc.T + b_fc


# ----------------------------------------------------------------------------
# Deterministic parameter init (PyTorch-style U(-1/sqrt(H), 1/sqrt(H)))
# ----------------------------------------------------------------------------
def init_params(key, input_size, hidden_size, num_layers, output_size):
    k = 1.0 / jnp.sqrt(hidden_size)
    lstm = []
    for layer in range(num_layers):
        d_in = input_size if layer == 0 else hidden_size
        key, k1, k2, k3, k4 = jax.random.split(key, 5)
        w_ih = jax.random.uniform(k1, (4 * hidden_size, d_in), jnp.float32, -k, k)
        w_hh = jax.random.uniform(k2, (4 * hidden_size, hidden_size), jnp.float32, -k, k)
        b_ih = jax.random.uniform(k3, (4 * hidden_size,), jnp.float32, -k, k)
        b_hh = jax.random.uniform(k4, (4 * hidden_size,), jnp.float32, -k, k)
        lstm.append((w_ih, w_hh, b_ih, b_hh))
    key, k5, k6 = jax.random.split(key, 3)
    kf = 1.0 / jnp.sqrt(hidden_size)
    w_fc = jax.random.uniform(k5, (output_size, hidden_size), jnp.float32, -kf, kf)
    b_fc = jax.random.uniform(k6, (output_size,), jnp.float32, -kf, kf)
    return {"lstm": lstm, "fc": (w_fc, b_fc)}


if __name__ == "__main__":
    # Small shapes consistent with RNNModel(input_size, hidden_size, num_layers,
    # output_size, dropout): 2D-joint features in, 3D-joint features out.
    B, T = 2, 8
    input_size, hidden_size, num_layers, output_size = 16, 32, 2, 24

    key = jax.random.PRNGKey(0)
    key, pkey, xkey = jax.random.split(key, 3)
    params = init_params(pkey, input_size, hidden_size, num_layers, output_size)
    x = jax.random.normal(xkey, (B, T, input_size), jnp.float32)

    out = jax.block_until_ready(rnn_model_forward(x, params))
    ref = rnn_model_reference(x, params)

    assert out.shape == (B, output_size), out.shape
    assert jnp.allclose(out, ref, atol=1e-4, rtol=1e-4), (
        float(jnp.max(jnp.abs(out - ref)))
    )
    print("KERNEL_OK")
</pallas_src>

<mosaic_0001>
module attributes {stable_mosaic.version = 11 : i64} {
  func.func @kernel(%arg0: memref<16x16xf32, #tpu.memory_space<vmem>>, %arg1: memref<16x128xf32, #tpu.memory_space<vmem>>, %arg2: memref<32x128xf32, #tpu.memory_space<vmem>>, %arg3: memref<1x128xf32, #tpu.memory_space<vmem>>, %arg4: memref<32x128xf32, #tpu.memory_space<vmem>>, %arg5: memref<32x128xf32, #tpu.memory_space<vmem>>, %arg6: memref<1x128xf32, #tpu.memory_space<vmem>>, %arg7: memref<32x24xf32, #tpu.memory_space<vmem>>, %arg8: memref<1x24xf32, #tpu.memory_space<vmem>>, %arg9: memref<2x24xf32, #tpu.memory_space<vmem>>, %arg10: memref<16x128xf32, #tpu.memory_space<vmem>>, %arg11: memref<16x32xf32, #tpu.memory_space<vmem>>, %arg12: memref<2x32xf32, #tpu.memory_space<vmem>>, %arg13: memref<2x32xf32, #tpu.memory_space<vmem>>) attributes {dimension_semantics = [], scalar_prefetch = 0 : i64, scratch_operands = 4 : i64, tpu.core_type = #tpu.core_type<tc>} {
    %c0 = arith.constant 0 : index
    %c0_0 = arith.constant 0 : index
    %0 = vector.load %arg0[%c0, %c0_0] : memref<16x16xf32, #tpu.memory_space<vmem>>, vector<16x16xf32>
    %c0_1 = arith.constant 0 : index
    %c0_2 = arith.constant 0 : index
    %1 = vector.load %arg1[%c0_1, %c0_2] : memref<16x128xf32, #tpu.memory_space<vmem>>, vector<16x128xf32>
    %cst = arith.constant dense<0.000000e+00> : vector<16x128xf32>
    %2 = tpu.matmul %0, %1, %cst {dimension_numbers = #tpu.dot_dimension_numbers<[1], [0], [0], [1], [0, 0, 1, 1], [], []>} : vector<16x16xf32>, vector<16x128xf32>, vector<16x128xf32> -> vector<16x128xf32>
    %c0_3 = arith.constant 0 : index
    %c0_4 = arith.constant 0 : index
    %3 = vector.load %arg3[%c0_3, %c0_4] : memref<1x128xf32, #tpu.memory_space<vmem>>, vector<1x128xf32>
    %4 = vector.broadcast %3 : vector<1x128xf32> to vector<16x128xf32>
    %5 = arith.addf %2, %4 : vector<16x128xf32>
    %c0_5 = arith.constant 0 : index
    %c0_6 = arith.constant 0 : index
    %6 = vector.load %arg10[%c0_5, %c0_6] : memref<16x128xf32, #tpu.memory_space<vmem>>, vector<16x128xf32>
    tpu.vector_store %arg10[%c0_5, %c0_6], %5 {strides = array<i32>} : memref<16x128xf32, #tpu.memory_space<vmem>>, vector<16x128xf32>,
    %c0_7 = arith.constant 0 : index
    %c0_8 = arith.constant 0 : index
    %7 = vector.load %arg2[%c0_7, %c0_8] : memref<32x128xf32, #tpu.memory_space<vmem>>, vector<32x128xf32>
    %cst_9 = arith.constant 0.000000e+00 : f32
    %8 = vector.broadcast %cst_9 : f32 to vector<2x32xf32>
    %c0_10 = arith.constant 0 : index
    %c0_11 = arith.constant 0 : index
    %9 = vector.load %arg12[%c0_10, %c0_11] : memref<2x32xf32, #tpu.memory_space<vmem>>, vector<2x32xf32>
    tpu.vector_store %arg12[%c0_10, %c0_11], %8 {strides = array<i32>} : memref<2x32xf32, #tpu.memory_space<vmem>>, vector<2x32xf32>,
    %cst_12 = arith.constant 0.000000e+00 : f32
    %10 = vector.broadcast %cst_12 : f32 to vector<2x32xf32>
    %c0_13 = arith.constant 0 : index
    %c0_14 = arith.constant 0 : index
    %11 = vector.load %arg13[%c0_13, %c0_14] : memref<2x32xf32, #tpu.memory_space<vmem>>, vector<2x32xf32>
    tpu.vector_store %arg13[%c0_13, %c0_14], %10 {strides = array<i32>} : memref<2x32xf32, #tpu.memory_space<vmem>>, vector<2x32xf32>,
    %c0_15 = arith.constant 0 : index
    %c0_16 = arith.constant 0 : index
    %12 = vector.load %arg10[%c0_15, %c0_16] : memref<16x128xf32, #tpu.memory_space<vmem>>, vector<2x128xf32>
    %c0_17 = arith.constant 0 : index
    %c0_18 = arith.constant 0 : index
    %13 = vector.load %arg12[%c0_17, %c0_18] : memref<2x32xf32, #tpu.memory_space<vmem>>, vector<2x32xf32>
    %cst_19 = arith.constant dense<0.000000e+00> : vector<2x128xf32>
    %14 = tpu.matmul %13, %7, %cst_19 {dimension_numbers = #tpu.dot_dimension_numbers<[1], [0], [0], [1], [0, 0, 1, 1], [], []>} : vector<2x32xf32>, vector<32x128xf32>, vector<2x128xf32> -> vector<2x128xf32>
    %15 = arith.addf %12, %14 : vector<2x128xf32>
    %16 = vector.extract_strided_slice %15 {offsets = [0, 0], sizes = [2, 32], strides = [1, 1]} : vector<2x128xf32> to vector<2x32xf32>
    %17 = arith.negf %16 : vector<2x32xf32>
    %18 = math.exp %17 : vector<2x32xf32>
    %cst_20 = arith.constant 1.000000e+00 : f32
    %19 = vector.broadcast %cst_20 : f32 to vector<2x32xf32>
    %20 = arith.addf %19, %18 : vector<2x32xf32>
    %21 = arith.divf %19, %20 : vector<2x32xf32>
    %22 = vector.extract_strided_slice %15 {offsets = [0, 32], sizes = [2, 32], strides = [1, 1]} : vector<2x128xf32> to vector<2x32xf32>
    %23 = arith.negf %22 : vector<2x32xf32>
    %24 = math.exp %23 : vector<2x32xf32>
    %cst_21 = arith.constant 1.000000e+00 : f32
    %25 = vector.broadcast %cst_21 : f32 to vector<2x32xf32>
    %26 = arith.addf %25, %24 : vector<2x32xf32>
    %27 = arith.divf %25, %26 : vector<2x32xf32>
    %28 = vector.extract_strided_slice %15 {offsets = [0, 64], sizes = [2, 32], strides = [1, 1]} : vector<2x128xf32> to vector<2x32xf32>
    %29 = math.tanh %28 : vector<2x32xf32>
    %30 = vector.extract_strided_slice %15 {offsets = [0, 96], sizes = [2, 32], strides = [1, 1]} : vector<2x128xf32> to vector<2x32xf32>
    %31 = arith.negf %30 : vector<2x32xf32>
    %32 = math.exp %31 : vector<2x32xf32>
    %cst_22 = arith.constant 1.000000e+00 : f32
    %33 = vector.broadcast %cst_22 : f32 to vector<2x32xf32>
    %34 = arith.addf %33, %32 : vector<2x32xf32>
    %35 = arith.divf %33, %34 : vector<2x32xf32>
    %c0_23 = arith.constant 0 : index
    %c0_24 = arith.constant 0 : index
    %36 = vector.load %arg13[%c0_23, %c0_24] : memref<2x32xf32, #tpu.memory_space<vmem>>, vector<2x32xf32>
    %37 = arith.mulf %27, %36 : vector<2x32xf32>
    %38 = arith.mulf %21, %29 : vector<2x32xf32>
    %39 = arith.addf %37, %38 : vector<2x32xf32>
    %40 = math.tanh %39 : vector<2x32xf32>
    %41 = arith.mulf %35, %40 : vector<2x32xf32>
    %c0_25 = arith.constant 0 : index
    %c0_26 = arith.constant 0 : index
    %42 = vector.load %arg13[%c0_25, %c0_26] : memref<2x32xf32, #tpu.memory_space<vmem>>, vector<2x32xf32>
    tpu.vector_store %arg13[%c0_25, %c0_26], %39 {strides = array<i32>} : memref<2x32xf32, #tpu.memory_space<vmem>>, vector<2x32xf32>,
    %c0_27 = arith.constant 0 : index
    %c0_28 = arith.constant 0 : index
    %43 = vector.load %arg12[%c0_27, %c0_28] : memref<2x32xf32, #tpu.memory_space<vmem>>, vector<2x32xf32>
    tpu.vector_store %arg12[%c0_27, %c0_28], %41 {strides = array<i32>} : memref<2x32xf32, #tpu.memory_space<vmem>>, vector<2x32xf32>,
    %c0_29 = arith.constant 0 : index
    %c0_30 = arith.constant 0 : index
    %44 = vector.load %arg11[%c0_29, %c0_30] : memref<16x32xf32, #tpu.memory_space<vmem>>, vector<2x32xf32>
    tpu.vector_store %arg11[%c0_29, %c0_30], %41 {strides = array<i32>} : memref<16x32xf32, #tpu.memory_space<vmem>>, vector<2x32xf32>,
    %c2 = arith.constant 2 : index
    %c0_31 = arith.constant 0 : index
    %45 = vector.load %arg10[%c2, %c0_31] : memref<16x128xf32, #tpu.memory_space<vmem>>, vector<2x128xf32>
    %c0_32 = arith.constant 0 : index
    %c0_33 = arith.constant 0 : index
    %46 = vector.load %arg12[%c0_32, %c0_33] : memref<2x32xf32, #tpu.memory_space<vmem>>, vector<2x32xf32>
    %cst_34 = arith.constant dense<0.000000e+00> : vector<2x128xf32>
    %47 = tpu.matmul %46, %7, %cst_34 {dimension_numbers = #tpu.dot_dimension_numbers<[1], [0], [0], [1], [0, 0, 1, 1], [], []>} : vector<2x32xf32>, vector<32x128xf32>, vector<2x128xf32> -> vector<2x128xf32>
    %48 = arith.addf %45, %47 : vector<2x128xf32>
    %49 = vector.extract_strided_slice %48 {offsets = [0, 0], sizes = [2, 32], strides = [1, 1]} : vector<2x128xf32> to vector<2x32xf32>
    %50 = arith.negf %49 : vector<2x32xf32>
    %51 = math.exp %50 : vector<2x32xf32>
    %cst_35 = arith.constant 1.000000e+00 : f32
    %52 = vector.broadcast %cst_35 : f32 to vector<2x32xf32>
    %53 = arith.addf %52, %51 : vector<2x32xf32>
    %54 = arith.divf %52, %53 : vector<2x32xf32>
    %55 = vector.extract_strided_slice %48 {offsets = [0, 32], sizes = [2, 32], strides = [1, 1]} : vector<2x128xf32> to vector<2x32xf32>
    %56 = arith.negf %55 : vector<2x32xf32>
    %57 = math.exp %56 : vector<2x32xf32>
    %cst_36 = arith.constant 1.000000e+00 : f32
    %58 = vector.broadcast %cst_36 : f32 to vector<2x32xf32>
    %59 = arith.addf %58, %57 : vector<2x32xf32>
    %60 = arith.divf %58, %59 : vector<2x32xf32>
    %61 = vector.extract_strided_slice %48 {offsets = [0, 64], sizes = [2, 32], strides = [1, 1]} : vector<2x128xf32> to vector<2x32xf32>
    %62 = math.tanh %61 : vector<2x32xf32>
    %63 = vector.extract_strided_slice %48 {offsets = [0, 96], sizes = [2, 32], strides = [1, 1]} : vector<2x128xf32> to vector<2x32xf32>
    %64 = arith.negf %63 : vector<2x32xf32>
    %65 = math.exp %64 : vector<2x32xf32>
    %cst_37 = arith.constant 1.000000e+00 : f32
    %66 = vector.broadcast %cst_37 : f32 to vector<2x32xf32>
    %67 = arith.addf %66, %65 : vector<2x32xf32>
    %68 = arith.divf %66, %67 : vector<2x32xf32>
    %c0_38 = arith.constant 0 : index
    %c0_39 = arith.constant 0 : index
    %69 = vector.load %arg13[%c0_38, %c0_39] : memref<2x32xf32, #tpu.memory_space<vmem>>, vector<2x32xf32>
    %70 = arith.mulf %60, %69 : vector<2x32xf32>
    %71 = arith.mulf %54, %62 : vector<2x32xf32>
    %72 = arith.addf %70, %71 : vector<2x32xf32>
    %73 = math.tanh %72 : vector<2x32xf32>
    %74 = arith.mulf %68, %73 : vector<2x32xf32>
    %c0_40 = arith.constant 0 : index
    %c0_41 = arith.constant 0 : index
    %75 = vector.load %arg13[%c0_40, %c0_41] : memref<2x32xf32, #tpu.memory_space<vmem>>, vector<2x32xf32>
    tpu.vector_store %arg13[%c0_40, %c0_41], %72 {strides = array<i32>} : memref<2x32xf32, #tpu.memory_space<vmem>>, vector<2x32xf32>,
    %c0_42 = arith.constant 0 : index
    %c0_43 = arith.constant 0 : index
    %76 = vector.load %arg12[%c0_42, %c0_43] : memref<2x32xf32, #tpu.memory_space<vmem>>, vector<2x32xf32>
    tpu.vector_store %arg12[%c0_42, %c0_43], %74 {strides = array<i32>} : memref<2x32xf32, #tpu.memory_space<vmem>>, vector<2x32xf32>,
    %c2_44 = arith.constant 2 : index
    %c0_45 = arith.constant 0 : index
    %77 = vector.load %arg11[%c2_44, %c0_45] : memref<16x32xf32, #tpu.memory_space<vmem>>, vector<2x32xf32>
    tpu.vector_store %arg11[%c2_44, %c0_45], %74 {strides = array<i32>} : memref<16x32xf32, #tpu.memory_space<vmem>>, vector<2x32xf32>,
    %c4 = arith.constant 4 : index
    %c0_46 = arith.constant 0 : index
    %78 = vector.load %arg10[%c4, %c0_46] : memref<16x128xf32, #tpu.memory_space<vmem>>, vector<2x128xf32>
    %c0_47 = arith.constant 0 : index
    %c0_48 = arith.constant 0 : index
    %79 = vector.load %arg12[%c0_47, %c0_48] : memref<2x32xf32, #tpu.memory_space<vmem>>, vector<2x32xf32>
    %cst_49 = arith.constant dense<0.000000e+00> : vector<2x128xf32>
    %80 = tpu.matmul %79, %7, %cst_49 {dimension_numbers = #tpu.dot_dimension_numbers<[1], [0], [0], [1], [0, 0, 1, 1], [], []>} : vector<2x32xf32>, vector<32x128xf32>, vector<2x128xf32> -> vector<2x128xf32>
    %81 = arith.addf %78, %80 : vector<2x128xf32>
    %82 = vector.extract_strided_slice %81 {offsets = [0, 0], sizes = [2, 32], strides = [1, 1]} : vector<2x128xf32> to vector<2x32xf32>
    %83 = arith.negf %82 : vector<2x32xf32>
    %84 = math.exp %83 : vector<2x32xf32>
    %cst_50 = arith.constant 1.000000e+00 : f32
    %85 = vector.broadcast %cst_50 : f32 to vector<2x32xf32>
    %86 = arith.addf %85, %84 : vector<2x32xf32>
    %87 = arith.divf %85, %86 : vector<2x32xf32>
    %88 = vector.extract_strided_slice %81 {offsets = [0, 32], sizes = [2, 32], strides = [1, 1]} : vector<2x128xf32> to vector<2x32xf32>
    %89 = arith.negf %88 : vector<2x32xf32>
    %90 = math.exp %89 : vector<2x32xf32>
    %cst_51 = arith.constant 1.000000e+00 : f32
    %91 = vector.broadcast %cst_51 : f32 to vector<2x32xf32>
    %92 = arith.addf %91, %90 : vector<2x32xf32>
    %93 = arith.divf %91, %92 : vector<2x32xf32>
    %94 = vector.extract_strided_slice %81 {offsets = [0, 64], sizes = [2, 32], strides = [1, 1]} : vector<2x128xf32> to vector<2x32xf32>
    %95 = math.tanh %94 : vector<2x32xf32>
    %96 = vector.extract_strided_slice %81 {offsets = [0, 96], sizes = [2, 32], strides = [1, 1]} : vector<2x128xf32> to vector<2x32xf32>
    %97 = arith.negf %96 : vector<2x32xf32>
    %98 = math.exp %97 : vector<2x32xf32>
    %cst_52 = arith.constant 1.000000e+00 : f32
    %99 = vector.broadcast %cst_52 : f32 to vector<2x32xf32>
    %100 = arith.addf %99, %98 : vector<2x32xf32>
    %101 = arith.divf %99, %100 : vector<2x32xf32>
    %c0_53 = arith.constant 0 : index
    %c0_54 = arith.constant 0 : index
    %102 = vector.load %arg13[%c0_53, %c0_54] : memref<2x32xf32, #tpu.memory_space<vmem>>, vector<2x32xf32>
    %103 = arith.mulf %93, %102 : vector<2x32xf32>
    %104 = arith.mulf %87, %95 : vector<2x32xf32>
    %105 = arith.addf %103, %104 : vector<2x32xf32>
    %106 = math.tanh %105 : vector<2x32xf32>
    %107 = arith.mulf %101, %106 : vector<2x32xf32>
    %c0_55 = arith.constant 0 : index
    %c0_56 = arith.constant 0 : index
    %108 = vector.load %arg13[%c0_55, %c0_56] : memref<2x32xf32, #tpu.memory_space<vmem>>, vector<2x32xf32>
    tpu.vector_store %arg13[%c0_55, %c0_56], %105 {strides = array<i32>} : memref<2x32xf32, #tpu.memory_space<vmem>>, vector<2x32xf32>,
    %c0_57 = arith.constant 0 : index
    %c0_58 = arith.constant 0 : index
    %109 = vector.load %arg12[%c0_57, %c0_58] : memref<2x32xf32, #tpu.memory_space<vmem>>, vector<2x32xf32>
    tpu.vector_store %arg12[%c0_57, %c0_58], %107 {strides = array<i32>} : memref<2x32xf32, #tpu.memory_space<vmem>>, vector<2x32xf32>,
    %c4_59 = arith.constant 4 : index
    %c0_60 = arith.constant 0 : index
    %110 = vector.load %arg11[%c4_59, %c0_60] : memref<16x32xf32, #tpu.memory_space<vmem>>, vector<2x32xf32>
    tpu.vector_store %arg11[%c4_59, %c0_60], %107 {strides = array<i32>} : memref<16x32xf32, #tpu.memory_space<vmem>>, vector<2x32xf32>,
    %c6 = arith.constant 6 : index
    %c0_61 = arith.constant 0 : index
    %111 = vector.load %arg10[%c6, %c0_61] : memref<16x128xf32, #tpu.memory_space<vmem>>, vector<2x128xf32>
    %c0_62 = arith.constant 0 : index
    %c0_63 = arith.constant 0 : index
    %112 = vector.load %arg12[%c0_62, %c0_63] : memref<2x32xf32, #tpu.memory_space<vmem>>, vector<2x32xf32>
    %cst_64 = arith.constant dense<0.000000e+00> : vector<2x128xf32>
    %113 = tpu.matmul %112, %7, %cst_64 {dimension_numbers = #tpu.dot_dimension_numbers<[1], [0], [0], [1], [0, 0, 1, 1], [], []>} : vector<2x32xf32>, vector<32x128xf32>, vector<2x128xf32> -> vector<2x128xf32>
    %114 = arith.addf %111, %113 : vector<2x128xf32>
    %115 = vector.extract_strided_slice %114 {offsets = [0, 0], sizes = [2, 32], strides = [1, 1]} : vector<2x128xf32> to vector<2x32xf32>
    %116 = arith.negf %115 : vector<2x32xf32>
    %117 = math.exp %116 : vector<2x32xf32>
    %cst_65 = arith.constant 1.000000e+00 : f32
    %118 = vector.broadcast %cst_65 : f32 to vector<2x32xf32>
    %119 = arith.addf %118, %117 : vector<2x32xf32>
    %120 = arith.divf %118, %119 : vector<2x32xf32>
    %121 = vector.extract_strided_slice %114 {offsets = [0, 32], sizes = [2, 32], strides = [1, 1]} : vector<2x128xf32> to vector<2x32xf32>
    %122 = arith.negf %121 : vector<2x32xf32>
    %123 = math.exp %122 : vector<2x32xf32>
    %cst_66 = arith.constant 1.000000e+00 : f32
    %124 = vector.broadcast %cst_66 : f32 to vector<2x32xf32>
    %125 = arith.addf %124, %123 : vector<2x32xf32>
    %126 = arith.divf %124, %125 : vector<2x32xf32>
    %127 = vector.extract_strided_slice %114 {offsets = [0, 64], sizes = [2, 32], strides = [1, 1]} : vector<2x128xf32> to vector<2x32xf32>
    %128 = math.tanh %127 : vector<2x32xf32>
    %129 = vector.extract_strided_slice %114 {offsets = [0, 96], sizes = [2, 32], strides = [1, 1]} : vector<2x128xf32> to vector<2x32xf32>
    %130 = arith.negf %129 : vector<2x32xf32>
    %131 = math.exp %130 : vector<2x32xf32>
    %cst_67 = arith.constant 1.000000e+00 : f32
    %132 = vector.broadcast %cst_67 : f32 to vector<2x32xf32>
    %133 = arith.addf %132, %131 : vector<2x32xf32>
    %134 = arith.divf %132, %133 : vector<2x32xf32>
    %c0_68 = arith.constant 0 : index
    %c0_69 = arith.constant 0 : index
    %135 = vector.load %arg13[%c0_68, %c0_69] : memref<2x32xf32, #tpu.memory_space<vmem>>, vector<2x32xf32>
    %136 = arith.mulf %126, %135 : vector<2x32xf32>
    %137 = arith.mulf %120, %128 : vector<2x32xf32>
    %138 = arith.addf %136, %137 : vector<2x32xf32>
    %139 = math.tanh %138 : vector<2x32xf32>
    %140 = arith.mulf %134, %139 : vector<2x32xf32>
    %c0_70 = arith.constant 0 : index
    %c0_71 = arith.constant 0 : index
    %141 = vector.load %arg13[%c0_70, %c0_71] : memref<2x32xf32, #tpu.memory_space<vmem>>, vector<2x32xf32>
    tpu.vector_store %arg13[%c0_70, %c0_71], %138 {strides = array<i32>} : memref<2x32xf32, #tpu.memory_space<vmem>>, vector<2x32xf32>,
    %c0_72 = arith.constant 0 : index
    %c0_73 = arith.constant 0 : index
    %142 = vector.load %arg12[%c0_72, %c0_73] : memref<2x32xf32, #tpu.memory_space<vmem>>, vector<2x32xf32>
    tpu.vector_store %arg12[%c0_72, %c0_73], %140 {strides = array<i32>} : memref<2x32xf32, #tpu.memory_space<vmem>>, vector<2x32xf32>,
    %c6_74 = arith.constant 6 : index
    %c0_75 = arith.constant 0 : index
    %143 = vector.load %arg11[%c6_74, %c0_75] : memref<16x32xf32, #tpu.memory_space<vmem>>, vector<2x32xf32>
    tpu.vector_store %arg11[%c6_74, %c0_75], %140 {strides = array<i32>} : memref<16x32xf32, #tpu.memory_space<vmem>>, vector<2x32xf32>,
    %c8 = arith.constant 8 : index
    %c0_76 = arith.constant 0 : index
    %144 = vector.load %arg10[%c8, %c0_76] : memref<16x128xf32, #tpu.memory_space<vmem>>, vector<2x128xf32>
    %c0_77 = arith.constant 0 : index
    %c0_78 = arith.constant 0 : index
    %145 = vector.load %arg12[%c0_77, %c0_78] : memref<2x32xf32, #tpu.memory_space<vmem>>, vector<2x32xf32>
    %cst_79 = arith.constant dense<0.000000e+00> : vector<2x128xf32>
    %146 = tpu.matmul %145, %7, %cst_79 {dimension_numbers = #tpu.dot_dimension_numbers<[1], [0], [0], [1], [0, 0, 1, 1], [], []>} : vector<2x32xf32>, vector<32x128xf32>, vector<2x128xf32> -> vector<2x128xf32>
    %147 = arith.addf %144, %146 : vector<2x128xf32>
    %148 = vector.extract_strided_slice %147 {offsets = [0, 0], sizes = [2, 32], strides = [1, 1]} : vector<2x128xf32> to vector<2x32xf32>
    %149 = arith.negf %148 : vector<2x32xf32>
    %150 = math.exp %149 : vector<2x32xf32>
    %cst_80 = arith.constant 1.000000e+00 : f32
    %151 = vector.broadcast %cst_80 : f32 to vector<2x32xf32>
    %152 = arith.addf %151, %150 : vector<2x32xf32>
    %153 = arith.divf %151, %152 : vector<2x32xf32>
    %154 = vector.extract_strided_slice %147 {offsets = [0, 32], sizes = [2, 32], strides = [1, 1]} : vector<2x128xf32> to vector<2x32xf32>
    %155 = arith.negf %154 : vector<2x32xf32>
    %156 = math.exp %155 : vector<2x32xf32>
    %cst_81 = arith.constant 1.000000e+00 : f32
    %157 = vector.broadcast %cst_81 : f32 to vector<2x32xf32>
    %158 = arith.addf %157, %156 : vector<2x32xf32>
    %159 = arith.divf %157, %158 : vector<2x32xf32>
    %160 = vector.extract_strided_slice %147 {offsets = [0, 64], sizes = [2, 32], strides = [1, 1]} : vector<2x128xf32> to vector<2x32xf32>
    %161 = math.tanh %160 : vector<2x32xf32>
    %162 = vector.extract_strided_slice %147 {offsets = [0, 96], sizes = [2, 32], strides = [1, 1]} : vector<2x128xf32> to vector<2x32xf32>
    %163 = arith.negf %162 : vector<2x32xf32>
    %164 = math.exp %163 : vector<2x32xf32>
    %cst_82 = arith.constant 1.000000e+00 : f32
    %165 = vector.broadcast %cst_82 : f32 to vector<2x32xf32>
    %166 = arith.addf %165, %164 : vector<2x32xf32>
    %167 = arith.divf %165, %166 : vector<2x32xf32>
    %c0_83 = arith.constant 0 : index
    %c0_84 = arith.constant 0 : index
    %168 = vector.load %arg13[%c0_83, %c0_84] : memref<2x32xf32, #tpu.memory_space<vmem>>, vector<2x32xf32>
    %169 = arith.mulf %159, %168 : vector<2x32xf32>
    %170 = arith.mulf %153, %161 : vector<2x32xf32>
    %171 = arith.addf %169, %170 : vector<2x32xf32>
    %172 = math.tanh %171 : vector<2x32xf32>
    %173 = arith.mulf %167, %172 : vector<2x32xf32>
    %c0_85 = arith.constant 0 : index
    %c0_86 = arith.constant 0 : index
    %174 = vector.load %arg13[%c0_85, %c0_86] : memref<2x32xf32, #tpu.memory_space<vmem>>, vector<2x32xf32>
    tpu.vector_store %arg13[%c0_85, %c0_86], %171 {strides = array<i32>} : memref<2x32xf32, #tpu.memory_space<vmem>>, vector<2x32xf32>,
    %c0_87 = arith.constant 0 : index
    %c0_88 = arith.constant 0 : index
    %175 = vector.load %arg12[%c0_87, %c0_88] : memref<2x32xf32, #tpu.memory_space<vmem>>, vector<2x32xf32>
    tpu.vector_store %arg12[%c0_87, %c0_88], %173 {strides = array<i32>} : memref<2x32xf32, #tpu.memory_space<vmem>>, vector<2x32xf32>,
    %c8_89 = arith.constant 8 : index
    %c0_90 = arith.constant 0 : index
    %176 = vector.load %arg11[%c8_89, %c0_90] : memref<16x32xf32, #tpu.memory_space<vmem>>, vector<2x32xf32>
    tpu.vector_store %arg11[%c8_89, %c0_90], %173 {strides = array<i32>} : memref<16x32xf32, #tpu.memory_space<vmem>>, vector<2x32xf32>,
    %c10 = arith.constant 10 : index
    %c0_91 = arith.constant 0 : index
    %177 = vector.load %arg10[%c10, %c0_91] : memref<16x128xf32, #tpu.memory_space<vmem>>, vector<2x128xf32>
    %c0_92 = arith.constant 0 : index
    %c0_93 = arith.constant 0 : index
    %178 = vector.load %arg12[%c0_92, %c0_93] : memref<2x32xf32, #tpu.memory_space<vmem>>, vector<2x32xf32>
    %cst_94 = arith.constant dense<0.000000e+00> : vector<2x128xf32>
    %179 = tpu.matmul %178, %7, %cst_94 {dimension_numbers = #tpu.dot_dimension_numbers<[1], [0], [0], [1], [0, 0, 1, 1], [], []>} : vector<2x32xf32>, vector<32x128xf32>, vector<2x128xf32> -> vector<2x128xf32>
    %180 = arith.addf %177, %179 : vector<2x128xf32>
    %181 = vector.extract_strided_slice %180 {offsets = [0, 0], sizes = [2, 32], strides = [1, 1]} : vector<2x128xf32> to vector<2x32xf32>
    %182 = arith.negf %181 : vector<2x32xf32>
    %183 = math.exp %182 : vector<2x32xf32>
    %cst_95 = arith.constant 1.000000e+00 : f32
    %184 = vector.broadcast %cst_95 : f32 to vector<2x32xf32>
    %185 = arith.addf %184, %183 : vector<2x32xf32>
    %186 = arith.divf %184, %185 : vector<2x32xf32>
    %187 = vector.extract_strided_slice %180 {offsets = [0, 32], sizes = [2, 32], strides = [1, 1]} : vector<2x128xf32> to vector<2x32xf32>
    %188 = arith.negf %187 : vector<2x32xf32>
    %189 = math.exp %188 : vector<2x32xf32>
    %cst_96 = arith.constant 1.000000e+00 : f32
    %190 = vector.broadcast %cst_96 : f32 to vector<2x32xf32>
    %191 = arith.addf %190, %189 : vector<2x32xf32>
    %192 = arith.divf %190, %191 : vector<2x32xf32>
    %193 = vector.extract_strided_slice %180 {offsets = [0, 64], sizes = [2, 32], strides = [1, 1]} : vector<2x128xf32> to vector<2x32xf32>
    %194 = math.tanh %193 : vector<2x32xf32>
    %195 = vector.extract_strided_slice %180 {offsets = [0, 96], sizes = [2, 32], strides = [1, 1]} : vector<2x128xf32> to vector<2x32xf32>
    %196 = arith.negf %195 : vector<2x32xf32>
    %197 = math.exp %196 : vector<2x32xf32>
    %cst_97 = arith.constant 1.000000e+00 : f32
    %198 = vector.broadcast %cst_97 : f32 to vector<2x32xf32>
    %199 = arith.addf %198, %197 : vector<2x32xf32>
    %200 = arith.divf %198, %199 : vector<2x32xf32>
    %c0_98 = arith.constant 0 : index
    %c0_99 = arith.constant 0 : index
    %201 = vector.load %arg13[%c0_98, %c0_99] : memref<2x32xf32, #tpu.memory_space<vmem>>, vector<2x32xf32>
    %202 = arith.mulf %192, %201 : vector<2x32xf32>
    %203 = arith.mulf %186, %194 : vector<2x32xf32>
    %204 = arith.addf %202, %203 : vector<2x32xf32>
    %205 = math.tanh %204 : vector<2x32xf32>
    %206 = arith.mulf %200, %205 : vector<2x32xf32>
    %c0_100 = arith.constant 0 : index
    %c0_101 = arith.constant 0 : index
    %207 = vector.load %arg13[%c0_100, %c0_101] : memref<2x32xf32, #tpu.memory_space<vmem>>, vector<2x32xf32>
    tpu.vector_store %arg13[%c0_100, %c0_101], %204 {strides = array<i32>} : memref<2x32xf32, #tpu.memory_space<vmem>>, vector<2x32xf32>,
    %c0_102 = arith.constant 0 : index
    %c0_103 = arith.constant 0 : index
    %208 = vector.load %arg12[%c0_102, %c0_103] : memref<2x32xf32, #tpu.memory_space<vmem>>, vector<2x32xf32>
    tpu.vector_store %arg12[%c0_102, %c0_103], %206 {strides = array<i32>} : memref<2x32xf32, #tpu.memory_space<vmem>>, vector<2x32xf32>,
    %c10_104 = arith.constant 10 : index
    %c0_105 = arith.constant 0 : index
    %209 = vector.load %arg11[%c10_104, %c0_105] : memref<16x32xf32, #tpu.memory_space<vmem>>, vector<2x32xf32>
    tpu.vector_store %arg11[%c10_104, %c0_105], %206 {strides = array<i32>} : memref<16x32xf32, #tpu.memory_space<vmem>>, vector<2x32xf32>,
    %c12 = arith.constant 12 : index
    %c0_106 = arith.constant 0 : index
    %210 = vector.load %arg10[%c12, %c0_106] : memref<16x128xf32, #tpu.memory_space<vmem>>, vector<2x128xf32>
    %c0_107 = arith.constant 0 : index
    %c0_108 = arith.constant 0 : index
    %211 = vector.load %arg12[%c0_107, %c0_108] : memref<2x32xf32, #tpu.memory_space<vmem>>, vector<2x32xf32>
    %cst_109 = arith.constant dense<0.000000e+00> : vector<2x128xf32>
    %212 = tpu.matmul %211, %7, %cst_109 {dimension_numbers = #tpu.dot_dimension_numbers<[1], [0], [0], [1], [0, 0, 1, 1], [], []>} : vector<2x32xf32>, vector<32x128xf32>, vector<2x128xf32> -> vector<2x128xf32>
    %213 = arith.addf %210, %212 : vector<2x128xf32>
    %214 = vector.extract_strided_slice %213 {offsets = [0, 0], sizes = [2, 32], strides = [1, 1]} : vector<2x128xf32> to vector<2x32xf32>
    %215 = arith.negf %214 : vector<2x32xf32>
    %216 = math.exp %215 : vector<2x32xf32>
    %cst_110 = arith.constant 1.000000e+00 : f32
    %217 = vector.broadcast %cst_110 : f32 to vector<2x32xf32>
    %218 = arith.addf %217, %216 : vector<2x32xf32>
    %219 = arith.divf %217, %218 : vector<2x32xf32>
    %220 = vector.extract_strided_slice %213 {offsets = [0, 32], sizes = [2, 32], strides = [1, 1]} : vector<2x128xf32> to vector<2x32xf32>
    %221 = arith.negf %220 : vector<2x32xf32>
    %222 = math.exp %221 : vector<2x32xf32>
    %cst_111 = arith.constant 1.000000e+00 : f32
    %223 = vector.broadcast %cst_111 : f32 to vector<2x32xf32>
    %224 = arith.addf %223, %222 : vector<2x32xf32>
    %225 = arith.divf %223, %224 : vector<2x32xf32>
    %226 = vector.extract_strided_slice %213 {offsets = [0, 64], sizes = [2, 32], strides = [1, 1]} : vector<2x128xf32> to vector<2x32xf32>
    %227 = math.tanh %226 : vector<2x32xf32>
    %228 = vector.extract_strided_slice %213 {offsets = [0, 96], sizes = [2, 32], strides = [1, 1]} : vector<2x128xf32> to vector<2x32xf32>
    %229 = arith.negf %228 : vector<2x32xf32>
    %230 = math.exp %229 : vector<2x32xf32>
    %cst_112 = arith.constant 1.000000e+00 : f32
    %231 = vector.broadcast %cst_112 : f32 to vector<2x32xf32>
    %232 = arith.addf %231, %230 : vector<2x32xf32>
    %233 = arith.divf %231, %232 : vector<2x32xf32>
    %c0_113 = arith.constant 0 : index
    %c0_114 = arith.constant 0 : index
    %234 = vector.load %arg13[%c0_113, %c0_114] : memref<2x32xf32, #tpu.memory_space<vmem>>, vector<2x32xf32>
    %235 = arith.mulf %225, %234 : vector<2x32xf32>
    %236 = arith.mulf %219, %227 : vector<2x32xf32>
    %237 = arith.addf %235, %236 : vector<2x32xf32>
    %238 = math.tanh %237 : vector<2x32xf32>
    %239 = arith.mulf %233, %238 : vector<2x32xf32>
    %c0_115 = arith.constant 0 : index
    %c0_116 = arith.constant 0 : index
    %240 = vector.load %arg13[%c0_115, %c0_116] : memref<2x32xf32, #tpu.memory_space<vmem>>, vector<2x32xf32>
    tpu.vector_store %arg13[%c0_115, %c0_116], %237 {strides = array<i32>} : memref<2x32xf32, #tpu.memory_space<vmem>>, vector<2x32xf32>,
    %c0_117 = arith.constant 0 : index
    %c0_118 = arith.constant 0 : index
    %241 = vector.load %arg12[%c0_117, %c0_118] : memref<2x32xf32, #tpu.memory_space<vmem>>, vector<2x32xf32>
    tpu.vector_store %arg12[%c0_117, %c0_118], %239 {strides = array<i32>} : memref<2x32xf32, #tpu.memory_space<vmem>>, vector<2x32xf32>,
    %c12_119 = arith.constant 12 : index
    %c0_120 = arith.constant 0 : index
    %242 = vector.load %arg11[%c12_119, %c0_120] : memref<16x32xf32, #tpu.memory_space<vmem>>, vector<2x32xf32>
    tpu.vector_store %arg11[%c12_119, %c0_120], %239 {strides = array<i32>} : memref<16x32xf32, #tpu.memory_space<vmem>>, vector<2x32xf32>,
    %c14 = arith.constant 14 : index
    %c0_121 = arith.constant 0 : index
    %243 = vector.load %arg10[%c14, %c0_121] : memref<16x128xf32, #tpu.memory_space<vmem>>, vector<2x128xf32>
    %c0_122 = arith.constant 0 : index
    %c0_123 = arith.constant 0 : index
    %244 = vector.load %arg12[%c0_122, %c0_123] : memref<2x32xf32, #tpu.memory_space<vmem>>, vector<2x32xf32>
    %cst_124 = arith.constant dense<0.000000e+00> : vector<2x128xf32>
    %245 = tpu.matmul %244, %7, %cst_124 {dimension_numbers = #tpu.dot_dimension_numbers<[1], [0], [0], [1], [0, 0, 1, 1], [], []>} : vector<2x32xf32>, vector<32x128xf32>, vector<2x128xf32> -> vector<2x128xf32>
    %246 = arith.addf %243, %245 : vector<2x128xf32>
    %247 = vector.extract_strided_slice %246 {offsets = [0, 0], sizes = [2, 32], strides = [1, 1]} : vector<2x128xf32> to vector<2x32xf32>
    %248 = arith.negf %247 : vector<2x32xf32>
    %249 = math.exp %248 : vector<2x32xf32>
    %cst_125 = arith.constant 1.000000e+00 : f32
    %250 = vector.broadcast %cst_125 : f32 to vector<2x32xf32>
    %251 = arith.addf %250, %249 : vector<2x32xf32>
    %252 = arith.divf %250, %251 : vector<2x32xf32>
    %253 = vector.extract_strided_slice %246 {offsets = [0, 32], sizes = [2, 32], strides = [1, 1]} : vector<2x128xf32> to vector<2x32xf32>
    %254 = arith.negf %253 : vector<2x32xf32>
    %255 = math.exp %254 : vector<2x32xf32>
    %cst_126 = arith.constant 1.000000e+00 : f32
    %256 = vector.broadcast %cst_126 : f32 to vector<2x32xf32>
    %257 = arith.addf %256, %255 : vector<2x32xf32>
    %258 = arith.divf %256, %257 : vector<2x32xf32>
    %259 = vector.extract_strided_slice %246 {offsets = [0, 64], sizes = [2, 32], strides = [1, 1]} : vector<2x128xf32> to vector<2x32xf32>
    %260 = math.tanh %259 : vector<2x32xf32>
    %261 = vector.extract_strided_slice %246 {offsets = [0, 96], sizes = [2, 32], strides = [1, 1]} : vector<2x128xf32> to vector<2x32xf32>
    %262 = arith.negf %261 : vector<2x32xf32>
    %263 = math.exp %262 : vector<2x32xf32>
    %cst_127 = arith.constant 1.000000e+00 : f32
    %264 = vector.broadcast %cst_127 : f32 to vector<2x32xf32>
    %265 = arith.addf %264, %263 : vector<2x32xf32>
    %266 = arith.divf %264, %265 : vector<2x32xf32>
    %c0_128 = arith.constant 0 : index
    %c0_129 = arith.constant 0 : index
    %267 = vector.load %arg13[%c0_128, %c0_129] : memref<2x32xf32, #tpu.memory_space<vmem>>, vector<2x32xf32>
    %268 = arith.mulf %258, %267 : vector<2x32xf32>
    %269 = arith.mulf %252, %260 : vector<2x32xf32>
    %270 = arith.addf %268, %269 : vector<2x32xf32>
    %271 = math.tanh %270 : vector<2x32xf32>
    %272 = arith.mulf %266, %271 : vector<2x32xf32>
    %c0_130 = arith.constant 0 : index
    %c0_131 = arith.constant 0 : index
    %273 = vector.load %arg13[%c0_130, %c0_131] : memref<2x32xf32, #tpu.memory_space<vmem>>, vector<2x32xf32>
    tpu.vector_store %arg13[%c0_130, %c0_131], %270 {strides = array<i32>} : memref<2x32xf32, #tpu.memory_space<vmem>>, vector<2x32xf32>,
    %c0_132 = arith.constant 0 : index
    %c0_133 = arith.constant 0 : index
    %274 = vector.load %arg12[%c0_132, %c0_133] : memref<2x32xf32, #tpu.memory_space<vmem>>, vector<2x32xf32>
    tpu.vector_store %arg12[%c0_132, %c0_133], %272 {strides = array<i32>} : memref<2x32xf32, #tpu.memory_space<vmem>>, vector<2x32xf32>,
    %c14_134 = arith.constant 14 : index
    %c0_135 = arith.constant 0 : index
    %275 = vector.load %arg11[%c14_134, %c0_135] : memref<16x32xf32, #tpu.memory_space<vmem>>, vector<2x32xf32>
    tpu.vector_store %arg11[%c14_134, %c0_135], %272 {strides = array<i32>} : memref<16x32xf32, #tpu.memory_space<vmem>>, vector<2x32xf32>,
    %c0_136 = arith.constant 0 : index
    %c0_137 = arith.constant 0 : index
    %276 = vector.load %arg11[%c0_136, %c0_137] : memref<16x32xf32, #tpu.memory_space<vmem>>, vector<16x32xf32>
    %c0_138 = arith.constant 0 : index
    %c0_139 = arith.constant 0 : index
    %277 = vector.load %arg4[%c0_138, %c0_139] : memref<32x128xf32, #tpu.memory_space<vmem>>, vector<32x128xf32>
    %cst_140 = arith.constant dense<0.000000e+00> : vector<16x128xf32>
    %278 = tpu.matmul %276, %277, %cst_140 {dimension_numbers = #tpu.dot_dimension_numbers<[1], [0], [0], [1], [0, 0, 1, 1], [], []>} : vector<16x32xf32>, vector<32x128xf32>, vector<16x128xf32> -> vector<16x128xf32>
    %c0_141 = arith.constant 0 : index
    %c0_142 = arith.constant 0 : index
    %279 = vector.load %arg6[%c0_141, %c0_142] : memref<1x128xf32, #tpu.memory_space<vmem>>, vector<1x128xf32>
    %280 = vector.broadcast %279 : vector<1x128xf32> to vector<16x128xf32>
    %281 = arith.addf %278, %280 : vector<16x128xf32>
    %c0_143 = arith.constant 0 : index
    %c0_144 = arith.constant 0 : index
    %282 = vector.load %arg10[%c0_143, %c0_144] : memref<16x128xf32, #tpu.memory_space<vmem>>, vector<16x128xf32>
    tpu.vector_store %arg10[%c0_143, %c0_144], %281 {strides = array<i32>} : memref<16x128xf32, #tpu.memory_space<vmem>>, vector<16x128xf32>,
    %c0_145 = arith.constant 0 : index
    %c0_146 = arith.constant 0 : index
    %283 = vector.load %arg5[%c0_145, %c0_146] : memref<32x128xf32, #tpu.memory_space<vmem>>, vector<32x128xf32>
    %cst_147 = arith.constant 0.000000e+00 : f32
    %284 = vector.broadcast %cst_147 : f32 to vector<2x32xf32>
    %c0_148 = arith.constant 0 : index
    %c0_149 = arith.constant 0 : index
    %285 = vector.load %arg12[%c0_148, %c0_149] : memref<2x32xf32, #tpu.memory_space<vmem>>, vector<2x32xf32>
    tpu.vector_store %arg12[%c0_148, %c0_149], %284 {strides = array<i32>} : memref<2x32xf32, #tpu.memory_space<vmem>>, vector<2x32xf32>,
    %cst_150 = arith.constant 0.000000e+00 : f32
    %286 = vector.broadcast %cst_150 : f32 to vector<2x32xf32>
    %c0_151 = arith.constant 0 : index
    %c0_152 = arith.constant 0 : index
    %287 = vector.load %arg13[%c0_151, %c0_152] : memref<2x32xf32, #tpu.memory_space<vmem>>, vector<2x32xf32>
    tpu.vector_store %arg13[%c0_151, %c0_152], %286 {strides = array<i32>} : memref<2x32xf32, #tpu.memory_space<vmem>>, vector<2x32xf32>,
    %c0_153 = arith.constant 0 : index
    %c0_154 = arith.constant 0 : index
    %288 = vector.load %arg10[%c0_153, %c0_154] : memref<16x128xf32, #tpu.memory_space<vmem>>, vector<2x128xf32>
    %c0_155 = arith.constant 0 : index
    %c0_156 = arith.constant 0 : index
    %289 = vector.load %arg12[%c0_155, %c0_156] : memref<2x32xf32, #tpu.memory_space<vmem>>, vector<2x32xf32>
    %cst_157 = arith.constant dense<0.000000e+00> : vector<2x128xf32>
    %290 = tpu.matmul %289, %283, %cst_157 {dimension_numbers = #tpu.dot_dimension_numbers<[1], [0], [0], [1], [0, 0, 1, 1], [], []>} : vector<2x32xf32>, vector<32x128xf32>, vector<2x128xf32> -> vector<2x128xf32>
    %291 = arith.addf %288, %290 : vector<2x128xf32>
    %292 = vector.extract_strided_slice %291 {offsets = [0, 0], sizes = [2, 32], strides = [1, 1]} : vector<2x128xf32> to vector<2x32xf32>
    %293 = arith.negf %292 : vector<2x32xf32>
    %294 = math.exp %293 : vector<2x32xf32>
    %cst_158 = arith.constant 1.000000e+00 : f32
    %295 = vector.broadcast %cst_158 : f32 to vector<2x32xf32>
    %296 = arith.addf %295, %294 : vector<2x32xf32>
    %297 = arith.divf %295, %296 : vector<2x32xf32>
    %298 = vector.extract_strided_slice %291 {offsets = [0, 32], sizes = [2, 32], strides = [1, 1]} : vector<2x128xf32> to vector<2x32xf32>
    %299 = arith.negf %298 : vector<2x32xf32>
    %300 = math.exp %299 : vector<2x32xf32>
    %cst_159 = arith.constant 1.000000e+00 : f32
    %301 = vector.broadcast %cst_159 : f32 to vector<2x32xf32>
    %302 = arith.addf %301, %300 : vector<2x32xf32>
    %303 = arith.divf %301, %302 : vector<2x32xf32>
    %304 = vector.extract_strided_slice %291 {offsets = [0, 64], sizes = [2, 32], strides = [1, 1]} : vector<2x128xf32> to vector<2x32xf32>
    %305 = math.tanh %304 : vector<2x32xf32>
    %306 = vector.extract_strided_slice %291 {offsets = [0, 96], sizes = [2, 32], strides = [1, 1]} : vector<2x128xf32> to vector<2x32xf32>
    %307 = arith.negf %306 : vector<2x32xf32>
    %308 = math.exp %307 : vector<2x32xf32>
    %cst_160 = arith.constant 1.000000e+00 : f32
    %309 = vector.broadcast %cst_160 : f32 to vector<2x32xf32>
    %310 = arith.addf %309, %308 : vector<2x32xf32>
    %311 = arith.divf %309, %310 : vector<2x32xf32>
    %c0_161 = arith.constant 0 : index
    %c0_162 = arith.constant 0 : index
    %312 = vector.load %arg13[%c0_161, %c0_162] : memref<2x32xf32, #tpu.memory_space<vmem>>, vector<2x32xf32>
    %313 = arith.mulf %303, %312 : vector<2x32xf32>
    %314 = arith.mulf %297, %305 : vector<2x32xf32>
    %315 = arith.addf %313, %314 : vector<2x32xf32>
    %316 = math.tanh %315 : vector<2x32xf32>
    %317 = arith.mulf %311, %316 : vector<2x32xf32>
    %c0_163 = arith.constant 0 : index
    %c0_164 = arith.constant 0 : index
    %318 = vector.load %arg13[%c0_163, %c0_164] : memref<2x32xf32, #tpu.memory_space<vmem>>, vector<2x32xf32>
    tpu.vector_store %arg13[%c0_163, %c0_164], %315 {strides = array<i32>} : memref<2x32xf32, #tpu.memory_space<vmem>>, vector<2x32xf32>,
    %c0_165 = arith.constant 0 : index
    %c0_166 = arith.constant 0 : index
    %319 = vector.load %arg12[%c0_165, %c0_166] : memref<2x32xf32, #tpu.memory_space<vmem>>, vector<2x32xf32>
    tpu.vector_store %arg12[%c0_165, %c0_166], %317 {strides = array<i32>} : memref<2x32xf32, #tpu.memory_space<vmem>>, vector<2x32xf32>,
    %c2_167 = arith.constant 2 : index
    %c0_168 = arith.constant 0 : index
    %320 = vector.load %arg10[%c2_167, %c0_168] : memref<16x128xf32, #tpu.memory_space<vmem>>, vector<2x128xf32>
    %c0_169 = arith.constant 0 : index
    %c0_170 = arith.constant 0 : index
    %321 = vector.load %arg12[%c0_169, %c0_170] : memref<2x32xf32, #tpu.memory_space<vmem>>, vector<2x32xf32>
    %cst_171 = arith.constant dense<0.000000e+00> : vector<2x128xf32>
    %322 = tpu.matmul %321, %283, %cst_171 {dimension_numbers = #tpu.dot_dimension_numbers<[1], [0], [0], [1], [0, 0, 1, 1], [], []>} : vector<2x32xf32>, vector<32x128xf32>, vector<2x128xf32> -> vector<2x128xf32>
    %323 = arith.addf %320, %322 : vector<2x128xf32>
    %324 = vector.extract_strided_slice %323 {offsets = [0, 0], sizes = [2, 32], strides = [1, 1]} : vector<2x128xf32> to vector<2x32xf32>
    %325 = arith.negf %324 : vector<2x32xf32>
    %326 = math.exp %325 : vector<2x32xf32>
    %cst_172 = arith.constant 1.000000e+00 : f32
    %327 = vector.broadcast %cst_172 : f32 to vector<2x32xf32>
    %328 = arith.addf %327, %326 : vector<2x32xf32>
    %329 = arith.divf %327, %328 : vector<2x32xf32>
    %330 = vector.extract_strided_slice %323 {offsets = [0, 32], sizes = [2, 32], strides = [1, 1]} : vector<2x128xf32> to vector<2x32xf32>
    %331 = arith.negf %330 : vector<2x32xf32>
    %332 = math.exp %331 : vector<2x32xf32>
    %cst_173 = arith.constant 1.000000e+00 : f32
    %333 = vector.broadcast %cst_173 : f32 to vector<2x32xf32>
    %334 = arith.addf %333, %332 : vector<2x32xf32>
    %335 = arith.divf %333, %334 : vector<2x32xf32>
    %336 = vector.extract_strided_slice %323 {offsets = [0, 64], sizes = [2, 32], strides = [1, 1]} : vector<2x128xf32> to vector<2x32xf32>
    %337 = math.tanh %336 : vector<2x32xf32>
    %338 = vector.extract_strided_slice %323 {offsets = [0, 96], sizes = [2, 32], strides = [1, 1]} : vector<2x128xf32> to vector<2x32xf32>
    %339 = arith.negf %338 : vector<2x32xf32>
    %340 = math.exp %339 : vector<2x32xf32>
    %cst_174 = arith.constant 1.000000e+00 : f32
    %341 = vector.broadcast %cst_174 : f32 to vector<2x32xf32>
    %342 = arith.addf %341, %340 : vector<2x32xf32>
    %343 = arith.divf %341, %342 : vector<2x32xf32>
    %c0_175 = arith.constant 0 : index
    %c0_176 = arith.constant 0 : index
    %344 = vector.load %arg13[%c0_175, %c0_176] : memref<2x32xf32, #tpu.memory_space<vmem>>, vector<2x32xf32>
    %345 = arith.mulf %335, %344 : vector<2x32xf32>
    %346 = arith.mulf %329, %337 : vector<2x32xf32>
    %347 = arith.addf %345, %346 : vector<2x32xf32>
    %348 = math.tanh %347 : vector<2x32xf32>
    %349 = arith.mulf %343, %348 : vector<2x32xf32>
    %c0_177 = arith.constant 0 : index
    %c0_178 = arith.constant 0 : index
    %350 = vector.load %arg13[%c0_177, %c0_178] : memref<2x32xf32, #tpu.memory_space<vmem>>, vector<2x32xf32>
    tpu.vector_store %arg13[%c0_177, %c0_178], %347 {strides = array<i32>} : memref<2x32xf32, #tpu.memory_space<vmem>>, vector<2x32xf32>,
    %c0_179 = arith.constant 0 : index
    %c0_180 = arith.constant 0 : index
    %351 = vector.load %arg12[%c0_179, %c0_180] : memref<2x32xf32, #tpu.memory_space<vmem>>, vector<2x32xf32>
    tpu.vector_store %arg12[%c0_179, %c0_180], %349 {strides = array<i32>} : memref<2x32xf32, #tpu.memory_space<vmem>>, vector<2x32xf32>,
    %c4_181 = arith.constant 4 : index
    %c0_182 = arith.constant 0 : index
    %352 = vector.load %arg10[%c4_181, %c0_182] : memref<16x128xf32, #tpu.memory_space<vmem>>, vector<2x128xf32>
    %c0_183 = arith.constant 0 : index
    %c0_184 = arith.constant 0 : index
    %353 = vector.load %arg12[%c0_183, %c0_184] : memref<2x32xf32, #tpu.memory_space<vmem>>, vector<2x32xf32>
    %cst_185 = arith.constant dense<0.000000e+00> : vector<2x128xf32>
    %354 = tpu.matmul %353, %283, %cst_185 {dimension_numbers = #tpu.dot_dimension_numbers<[1], [0], [0], [1], [0, 0, 1, 1], [], []>} : vector<2x32xf32>, vector<32x128xf32>, vector<2x128xf32> -> vector<2x128xf32>
    %355 = arith.addf %352, %354 : vector<2x128xf32>
    %356 = vector.extract_strided_slice %355 {offsets = [0, 0], sizes = [2, 32], strides = [1, 1]} : vector<2x128xf32> to vector<2x32xf32>
    %357 = arith.negf %356 : vector<2x32xf32>
    %358 = math.exp %357 : vector<2x32xf32>
    %cst_186 = arith.constant 1.000000e+00 : f32
    %359 = vector.broadcast %cst_186 : f32 to vector<2x32xf32>
    %360 = arith.addf %359, %358 : vector<2x32xf32>
    %361 = arith.divf %359, %360 : vector<2x32xf32>
    %362 = vector.extract_strided_slice %355 {offsets = [0, 32], sizes = [2, 32], strides = [1, 1]} : vector<2x128xf32> to vector<2x32xf32>
    %363 = arith.negf %362 : vector<2x32xf32>
    %364 = math.exp %363 : vector<2x32xf32>
    %cst_187 = arith.constant 1.000000e+00 : f32
    %365 = vector.broadcast %cst_187 : f32 to vector<2x32xf32>
    %366 = arith.addf %365, %364 : vector<2x32xf32>
    %367 = arith.divf %365, %366 : vector<2x32xf32>
    %368 = vector.extract_strided_slice %355 {offsets = [0, 64], sizes = [2, 32], strides = [1, 1]} : vector<2x128xf32> to vector<2x32xf32>
    %369 = math.tanh %368 : vector<2x32xf32>
    %370 = vector.extract_strided_slice %355 {offsets = [0, 96], sizes = [2, 32], strides = [1, 1]} : vector<2x128xf32> to vector<2x32xf32>
    %371 = arith.negf %370 : vector<2x32xf32>
    %372 = math.exp %371 : vector<2x32xf32>
    %cst_188 = arith.constant 1.000000e+00 : f32
    %373 = vector.broadcast %cst_188 : f32 to vector<2x32xf32>
    %374 = arith.addf %373, %372 : vector<2x32xf32>
    %375 = arith.divf %373, %374 : vector<2x32xf32>
    %c0_189 = arith.constant 0 : index
    %c0_190 = arith.constant 0 : index
    %376 = vector.load %arg13[%c0_189, %c0_190] : memref<2x32xf32, #tpu.memory_space<vmem>>, vector<2x32xf32>
    %377 = arith.mulf %367, %376 : vector<2x32xf32>
    %378 = arith.mulf %361, %369 : vector<2x32xf32>
    %379 = arith.addf %377, %378 : vector<2x32xf32>
    %380 = math.tanh %379 : vector<2x32xf32>
    %381 = arith.mulf %375, %380 : vector<2x32xf32>
    %c0_191 = arith.constant 0 : index
    %c0_192 = arith.constant 0 : index
    %382 = vector.load %arg13[%c0_191, %c0_192] : memref<2x32xf32, #tpu.memory_space<vmem>>, vector<2x32xf32>
    tpu.vector_store %arg13[%c0_191, %c0_192], %379 {strides = array<i32>} : memref<2x32xf32, #tpu.memory_space<vmem>>, vector<2x32xf32>,
    %c0_193 = arith.constant 0 : index
    %c0_194 = arith.constant 0 : index
    %383 = vector.load %arg12[%c0_193, %c0_194] : memref<2x32xf32, #tpu.memory_space<vmem>>, vector<2x32xf32>
    tpu.vector_store %arg12[%c0_193, %c0_194], %381 {strides = array<i32>} : memref<2x32xf32, #tpu.memory_space<vmem>>, vector<2x32xf32>,
    %c6_195 = arith.constant 6 : index
    %c0_196 = arith.constant 0 : index
    %384 = vector.load %arg10[%c6_195, %c0_196] : memref<16x128xf32, #tpu.memory_space<vmem>>, vector<2x128xf32>
    %c0_197 = arith.constant 0 : index
    %c0_198 = arith.constant 0 : index
    %385 = vector.load %arg12[%c0_197, %c0_198] : memref<2x32xf32, #tpu.memory_space<vmem>>, vector<2x32xf32>
    %cst_199 = arith.constant dense<0.000000e+00> : vector<2x128xf32>
    %386 = tpu.matmul %385, %283, %cst_199 {dimension_numbers = #tpu.dot_dimension_numbers<[1], [0], [0], [1], [0, 0, 1, 1], [], []>} : vector<2x32xf32>, vector<32x128xf32>, vector<2x128xf32> -> vector<2x128xf32>
    %387 = arith.addf %384, %386 : vector<2x128xf32>
    %388 = vector.extract_strided_slice %387 {offsets = [0, 0], sizes = [2, 32], strides = [1, 1]} : vector<2x128xf32> to vector<2x32xf32>
    %389 = arith.negf %388 : vector<2x32xf32>
    %390 = math.exp %389 : vector<2x32xf32>
    %cst_200 = arith.constant 1.000000e+00 : f32
    %391 = vector.broadcast %cst_200 : f32 to vector<2x32xf32>
    %392 = arith.addf %391, %390 : vector<2x32xf32>
    %393 = arith.divf %391, %392 : vector<2x32xf32>
    %394 = vector.extract_strided_slice %387 {offsets = [0, 32], sizes = [2, 32], strides = [1, 1]} : vector<2x128xf32> to vector<2x32xf32>
    %395 = arith.negf %394 : vector<2x32xf32>
    %396 = math.exp %395 : vector<2x32xf32>
    %cst_201 = arith.constant 1.000000e+00 : f32
    %397 = vector.broadcast %cst_201 : f32 to vector<2x32xf32>
    %398 = arith.addf %397, %396 : vector<2x32xf32>
    %399 = arith.divf %397, %398 : vector<2x32xf32>
    %400 = vector.extract_strided_slice %387 {offsets = [0, 64], sizes = [2, 32], strides = [1, 1]} : vector<2x128xf32> to vector<2x32xf32>
    %401 = math.tanh %400 : vector<2x32xf32>
    %402 = vector.extract_strided_slice %387 {offsets = [0, 96], sizes = [2, 32], strides = [1, 1]} : vector<2x128xf32> to vector<2x32xf32>
    %403 = arith.negf %402 : vector<2x32xf32>
    %404 = math.exp %403 : vector<2x32xf32>
    %cst_202 = arith.constant 1.000000e+00 : f32
    %405 = vector.broadcast %cst_202 : f32 to vector<2x32xf32>
    %406 = arith.addf %405, %404 : vector<2x32xf32>
    %407 = arith.divf %405, %406 : vector<2x32xf32>
    %c0_203 = arith.constant 0 : index
    %c0_204 = arith.constant 0 : index
    %408 = vector.load %arg13[%c0_203, %c0_204] : memref<2x32xf32, #tpu.memory_space<vmem>>, vector<2x32xf32>
    %409 = arith.mulf %399, %408 : vector<2x32xf32>
    %410 = arith.mulf %393, %401 : vector<2x32xf32>
    %411 = arith.addf %409, %410 : vector<2x32xf32>
    %412 = math.tanh %411 : vector<2x32xf32>
    %413 = arith.mulf %407, %412 : vector<2x32xf32>
    %c0_205 = arith.constant 0 : index
    %c0_206 = arith.constant 0 : index
    %414 = vector.load %arg13[%c0_205, %c0_206] : memref<2x32xf32, #tpu.memory_space<vmem>>, vector<2x32xf32>
    tpu.vector_store %arg13[%c0_205, %c0_206], %411 {strides = array<i32>} : memref<2x32xf32, #tpu.memory_space<vmem>>, vector<2x32xf32>,
    %c0_207 = arith.constant 0 : index
    %c0_208 = arith.constant 0 : index
    %415 = vector.load %arg12[%c0_207, %c0_208] : memref<2x32xf32, #tpu.memory_space<vmem>>, vector<2x32xf32>
    tpu.vector_store %arg12[%c0_207, %c0_208], %413 {strides = array<i32>} : memref<2x32xf32, #tpu.memory_space<vmem>>, vector<2x32xf32>,
    %c8_209 = arith.constant 8 : index
    %c0_210 = arith.constant 0 : index
    %416 = vector.load %arg10[%c8_209, %c0_210] : memref<16x128xf32, #tpu.memory_space<vmem>>, vector<2x128xf32>
    %c0_211 = arith.constant 0 : index
    %c0_212 = arith.constant 0 : index
    %417 = vector.load %arg12[%c0_211, %c0_212] : memref<2x32xf32, #tpu.memory_space<vmem>>, vector<2x32xf32>
    %cst_213 = arith.constant dense<0.000000e+00> : vector<2x128xf32>
    %418 = tpu.matmul %417, %283, %cst_213 {dimension_numbers = #tpu.dot_dimension_numbers<[1], [0], [0], [1], [0, 0, 1, 1], [], []>} : vector<2x32xf32>, vector<32x128xf32>, vector<2x128xf32> -> vector<2x128xf32>
    %419 = arith.addf %416, %418 : vector<2x128xf32>
    %420 = vector.extract_strided_slice %419 {offsets = [0, 0], sizes = [2, 32], strides = [1, 1]} : vector<2x128xf32> to vector<2x32xf32>
    %421 = arith.negf %420 : vector<2x32xf32>
    %422 = math.exp %421 : vector<2x32xf32>
    %cst_214 = arith.constant 1.000000e+00 : f32
    %423 = vector.broadcast %cst_214 : f32 to vector<2x32xf32>
    %424 = arith.addf %423, %422 : vector<2x32xf32>
    %425 = arith.divf %423, %424 : vector<2x32xf32>
    %426 = vector.extract_strided_slice %419 {offsets = [0, 32], sizes = [2, 32], strides = [1, 1]} : vector<2x128xf32> to vector<2x32xf32>
    %427 = arith.negf %426 : vector<2x32xf32>
    %428 = math.exp %427 : vector<2x32xf32>
    %cst_215 = arith.constant 1.000000e+00 : f32
    %429 = vector.broadcast %cst_215 : f32 to vector<2x32xf32>
    %430 = arith.addf %429, %428 : vector<2x32xf32>
    %431 = arith.divf %429, %430 : vector<2x32xf32>
    %432 = vector.extract_strided_slice %419 {offsets = [0, 64], sizes = [2, 32], strides = [1, 1]} : vector<2x128xf32> to vector<2x32xf32>
    %433 = math.tanh %432 : vector<2x32xf32>
    %434 = vector.extract_strided_slice %419 {offsets = [0, 96], sizes = [2, 32], strides = [1, 1]} : vector<2x128xf32> to vector<2x32xf32>
    %435 = arith.negf %434 : vector<2x32xf32>
    %436 = math.exp %435 : vector<2x32xf32>
    %cst_216 = arith.constant 1.000000e+00 : f32
    %437 = vector.broadcast %cst_216 : f32 to vector<2x32xf32>
    %438 = arith.addf %437, %436 : vector<2x32xf32>
    %439 = arith.divf %437, %438 : vector<2x32xf32>
    %c0_217 = arith.constant 0 : index
    %c0_218 = arith.constant 0 : index
    %440 = vector.load %arg13[%c0_217, %c0_218] : memref<2x32xf32, #tpu.memory_space<vmem>>, vector<2x32xf32>
    %441 = arith.mulf %431, %440 : vector<2x32xf32>
    %442 = arith.mulf %425, %433 : vector<2x32xf32>
    %443 = arith.addf %441, %442 : vector<2x32xf32>
    %444 = math.tanh %443 : vector<2x32xf32>
    %445 = arith.mulf %439, %444 : vector<2x32xf32>
    %c0_219 = arith.constant 0 : index
    %c0_220 = arith.constant 0 : index
    %446 = vector.load %arg13[%c0_219, %c0_220] : memref<2x32xf32, #tpu.memory_space<vmem>>, vector<2x32xf32>
    tpu.vector_store %arg13[%c0_219, %c0_220], %443 {strides = array<i32>} : memref<2x32xf32, #tpu.memory_space<vmem>>, vector<2x32xf32>,
    %c0_221 = arith.constant 0 : index
    %c0_222 = arith.constant 0 : index
    %447 = vector.load %arg12[%c0_221, %c0_222] : memref<2x32xf32, #tpu.memory_space<vmem>>, vector<2x32xf32>
    tpu.vector_store %arg12[%c0_221, %c0_222], %445 {strides = array<i32>} : memref<2x32xf32, #tpu.memory_space<vmem>>, vector<2x32xf32>,
    %c10_223 = arith.constant 10 : index
    %c0_224 = arith.constant 0 : index
    %448 = vector.load %arg10[%c10_223, %c0_224] : memref<16x128xf32, #tpu.memory_space<vmem>>, vector<2x128xf32>
    %c0_225 = arith.constant 0 : index
    %c0_226 = arith.constant 0 : index
    %449 = vector.load %arg12[%c0_225, %c0_226] : memref<2x32xf32, #tpu.memory_space<vmem>>, vector<2x32xf32>
    %cst_227 = arith.constant dense<0.000000e+00> : vector<2x128xf32>
    %450 = tpu.matmul %449, %283, %cst_227 {dimension_numbers = #tpu.dot_dimension_numbers<[1], [0], [0], [1], [0, 0, 1, 1], [], []>} : vector<2x32xf32>, vector<32x128xf32>, vector<2x128xf32> -> vector<2x128xf32>
    %451 = arith.addf %448, %450 : vector<2x128xf32>
    %452 = vector.extract_strided_slice %451 {offsets = [0, 0], sizes = [2, 32], strides = [1, 1]} : vector<2x128xf32> to vector<2x32xf32>
    %453 = arith.negf %452 : vector<2x32xf32>
    %454 = math.exp %453 : vector<2x32xf32>
    %cst_228 = arith.constant 1.000000e+00 : f32
    %455 = vector.broadcast %cst_228 : f32 to vector<2x32xf32>
    %456 = arith.addf %455, %454 : vector<2x32xf32>
    %457 = arith.divf %455, %456 : vector<2x32xf32>
    %458 = vector.extract_strided_slice %451 {offsets = [0, 32], sizes = [2, 32], strides = [1, 1]} : vector<2x128xf32> to vector<2x32xf32>
    %459 = arith.negf %458 : vector<2x32xf32>
    %460 = math.exp %459 : vector<2x32xf32>
    %cst_229 = arith.constant 1.000000e+00 : f32
    %461 = vector.broadcast %cst_229 : f32 to vector<2x32xf32>
    %462 = arith.addf %461, %460 : vector<2x32xf32>
    %463 = arith.divf %461, %462 : vector<2x32xf32>
    %464 = vector.extract_strided_slice %451 {offsets = [0, 64], sizes = [2, 32], strides = [1, 1]} : vector<2x128xf32> to vector<2x32xf32>
    %465 = math.tanh %464 : vector<2x32xf32>
    %466 = vector.extract_strided_slice %451 {offsets = [0, 96], sizes = [2, 32], strides = [1, 1]} : vector<2x128xf32> to vector<2x32xf32>
    %467 = arith.negf %466 : vector<2x32xf32>
    %468 = math.exp %467 : vector<2x32xf32>
    %cst_230 = arith.constant 1.000000e+00 : f32
    %469 = vector.broadcast %cst_230 : f32 to vector<2x32xf32>
    %470 = arith.addf %469, %468 : vector<2x32xf32>
    %471 = arith.divf %469, %470 : vector<2x32xf32>
    %c0_231 = arith.constant 0 : index
    %c0_232 = arith.constant 0 : index
    %472 = vector.load %arg13[%c0_231, %c0_232] : memref<2x32xf32, #tpu.memory_space<vmem>>, vector<2x32xf32>
    %473 = arith.mulf %463, %472 : vector<2x32xf32>
    %474 = arith.mulf %457, %465 : vector<2x32xf32>
    %475 = arith.addf %473, %474 : vector<2x32xf32>
    %476 = math.tanh %475 : vector<2x32xf32>
    %477 = arith.mulf %471, %476 : vector<2x32xf32>
    %c0_233 = arith.constant 0 : index
    %c0_234 = arith.constant 0 : index
    %478 = vector.load %arg13[%c0_233, %c0_234] : memref<2x32xf32, #tpu.memory_space<vmem>>, vector<2x32xf32>
    tpu.vector_store %arg13[%c0_233, %c0_234], %475 {strides = array<i32>} : memref<2x32xf32, #tpu.memory_space<vmem>>, vector<2x32xf32>,
    %c0_235 = arith.constant 0 : index
    %c0_236 = arith.constant 0 : index
    %479 = vector.load %arg12[%c0_235, %c0_236] : memref<2x32xf32, #tpu.memory_space<vmem>>, vector<2x32xf32>
    tpu.vector_store %arg12[%c0_235, %c0_236], %477 {strides = array<i32>} : memref<2x32xf32, #tpu.memory_space<vmem>>, vector<2x32xf32>,
    %c12_237 = arith.constant 12 : index
    %c0_238 = arith.constant 0 : index
    %480 = vector.load %arg10[%c12_237, %c0_238] : memref<16x128xf32, #tpu.memory_space<vmem>>, vector<2x128xf32>
    %c0_239 = arith.constant 0 : index
    %c0_240 = arith.constant 0 : index
    %481 = vector.load %arg12[%c0_239, %c0_240] : memref<2x32xf32, #tpu.memory_space<vmem>>, vector<2x32xf32>
    %cst_241 = arith.constant dense<0.000000e+00> : vector<2x128xf32>
    %482 = tpu.matmul %481, %283, %cst_241 {dimension_numbers = #tpu.dot_dimension_numbers<[1], [0], [0], [1], [0, 0, 1, 1], [], []>} : vector<2x32xf32>, vector<32x128xf32>, vector<2x128xf32> -> vector<2x128xf32>
    %483 = arith.addf %480, %482 : vector<2x128xf32>
    %484 = vector.extract_strided_slice %483 {offsets = [0, 0], sizes = [2, 32], strides = [1, 1]} : vector<2x128xf32> to vector<2x32xf32>
    %485 = arith.negf %484 : vector<2x32xf32>
    %486 = math.exp %485 : vector<2x32xf32>
    %cst_242 = arith.constant 1.000000e+00 : f32
    %487 = vector.broadcast %cst_242 : f32 to vector<2x32xf32>
    %488 = arith.addf %487, %486 : vector<2x32xf32>
    %489 = arith.divf %487, %488 : vector<2x32xf32>
    %490 = vector.extract_strided_slice %483 {offsets = [0, 32], sizes = [2, 32], strides = [1, 1]} : vector<2x128xf32> to vector<2x32xf32>
    %491 = arith.negf %490 : vector<2x32xf32>
    %492 = math.exp %491 : vector<2x32xf32>
    %cst_243 = arith.constant 1.000000e+00 : f32
    %493 = vector.broadcast %cst_243 : f32 to vector<2x32xf32>
    %494 = arith.addf %493, %492 : vector<2x32xf32>
    %495 = arith.divf %493, %494 : vector<2x32xf32>
    %496 = vector.extract_strided_slice %483 {offsets = [0, 64], sizes = [2, 32], strides = [1, 1]} : vector<2x128xf32> to vector<2x32xf32>
    %497 = math.tanh %496 : vector<2x32xf32>
    %498 = vector.extract_strided_slice %483 {offsets = [0, 96], sizes = [2, 32], strides = [1, 1]} : vector<2x128xf32> to vector<2x32xf32>
    %499 = arith.negf %498 : vector<2x32xf32>
    %500 = math.exp %499 : vector<2x32xf32>
    %cst_244 = arith.constant 1.000000e+00 : f32
    %501 = vector.broadcast %cst_244 : f32 to vector<2x32xf32>
    %502 = arith.addf %501, %500 : vector<2x32xf32>
    %503 = arith.divf %501, %502 : vector<2x32xf32>
    %c0_245 = arith.constant 0 : index
    %c0_246 = arith.constant 0 : index
    %504 = vector.load %arg13[%c0_245, %c0_246] : memref<2x32xf32, #tpu.memory_space<vmem>>, vector<2x32xf32>
    %505 = arith.mulf %495, %504 : vector<2x32xf32>
    %506 = arith.mulf %489, %497 : vector<2x32xf32>
    %507 = arith.addf %505, %506 : vector<2x32xf32>
    %508 = math.tanh %507 : vector<2x32xf32>
    %509 = arith.mulf %503, %508 : vector<2x32xf32>
    %c0_247 = arith.constant 0 : index
    %c0_248 = arith.constant 0 : index
    %510 = vector.load %arg13[%c0_247, %c0_248] : memref<2x32xf32, #tpu.memory_space<vmem>>, vector<2x32xf32>
    tpu.vector_store %arg13[%c0_247, %c0_248], %507 {strides = array<i32>} : memref<2x32xf32, #tpu.memory_space<vmem>>, vector<2x32xf32>,
    %c0_249 = arith.constant 0 : index
    %c0_250 = arith.constant 0 : index
    %511 = vector.load %arg12[%c0_249, %c0_250] : memref<2x32xf32, #tpu.memory_space<vmem>>, vector<2x32xf32>
    tpu.vector_store %arg12[%c0_249, %c0_250], %509 {strides = array<i32>} : memref<2x32xf32, #tpu.memory_space<vmem>>, vector<2x32xf32>,
    %c14_251 = arith.constant 14 : index
    %c0_252 = arith.constant 0 : index
    %512 = vector.load %arg10[%c14_251, %c0_252] : memref<16x128xf32, #tpu.memory_space<vmem>>, vector<2x128xf32>
    %c0_253 = arith.constant 0 : index
    %c0_254 = arith.constant 0 : index
    %513 = vector.load %arg12[%c0_253, %c0_254] : memref<2x32xf32, #tpu.memory_space<vmem>>, vector<2x32xf32>
    %cst_255 = arith.constant dense<0.000000e+00> : vector<2x128xf32>
    %514 = tpu.matmul %513, %283, %cst_255 {dimension_numbers = #tpu.dot_dimension_numbers<[1], [0], [0], [1], [0, 0, 1, 1], [], []>} : vector<2x32xf32>, vector<32x128xf32>, vector<2x128xf32> -> vector<2x128xf32>
    %515 = arith.addf %512, %514 : vector<2x128xf32>
    %516 = vector.extract_strided_slice %515 {offsets = [0, 0], sizes = [2, 32], strides = [1, 1]} : vector<2x128xf32> to vector<2x32xf32>
    %517 = arith.negf %516 : vector<2x32xf32>
    %518 = math.exp %517 : vector<2x32xf32>
    %cst_256 = arith.constant 1.000000e+00 : f32
    %519 = vector.broadcast %cst_256 : f32 to vector<2x32xf32>
    %520 = arith.addf %519, %518 : vector<2x32xf32>
    %521 = arith.divf %519, %520 : vector<2x32xf32>
    %522 = vector.extract_strided_slice %515 {offsets = [0, 32], sizes = [2, 32], strides = [1, 1]} : vector<2x128xf32> to vector<2x32xf32>
    %523 = arith.negf %522 : vector<2x32xf32>
    %524 = math.exp %523 : vector<2x32xf32>
    %cst_257 = arith.constant 1.000000e+00 : f32
    %525 = vector.broadcast %cst_257 : f32 to vector<2x32xf32>
    %526 = arith.addf %525, %524 : vector<2x32xf32>
    %527 = arith.divf %525, %526 : vector<2x32xf32>
    %528 = vector.extract_strided_slice %515 {offsets = [0, 64], sizes = [2, 32], strides = [1, 1]} : vector<2x128xf32> to vector<2x32xf32>
    %529 = math.tanh %528 : vector<2x32xf32>
    %530 = vector.extract_strided_slice %515 {offsets = [0, 96], sizes = [2, 32], strides = [1, 1]} : vector<2x128xf32> to vector<2x32xf32>
    %531 = arith.negf %530 : vector<2x32xf32>
    %532 = math.exp %531 : vector<2x32xf32>
    %cst_258 = arith.constant 1.000000e+00 : f32
    %533 = vector.broadcast %cst_258 : f32 to vector<2x32xf32>
    %534 = arith.addf %533, %532 : vector<2x32xf32>
    %535 = arith.divf %533, %534 : vector<2x32xf32>
    %c0_259 = arith.constant 0 : index
    %c0_260 = arith.constant 0 : index
    %536 = vector.load %arg13[%c0_259, %c0_260] : memref<2x32xf32, #tpu.memory_space<vmem>>, vector<2x32xf32>
    %537 = arith.mulf %527, %536 : vector<2x32xf32>
    %538 = arith.mulf %521, %529 : vector<2x32xf32>
    %539 = arith.addf %537, %538 : vector<2x32xf32>
    %540 = math.tanh %539 : vector<2x32xf32>
    %541 = arith.mulf %535, %540 : vector<2x32xf32>
    %c0_261 = arith.constant 0 : index
    %c0_262 = arith.constant 0 : index
    %542 = vector.load %arg13[%c0_261, %c0_262] : memref<2x32xf32, #tpu.memory_space<vmem>>, vector<2x32xf32>
    tpu.vector_store %arg13[%c0_261, %c0_262], %539 {strides = array<i32>} : memref<2x32xf32, #tpu.memory_space<vmem>>, vector<2x32xf32>,
    %c0_263 = arith.constant 0 : index
    %c0_264 = arith.constant 0 : index
    %543 = vector.load %arg12[%c0_263, %c0_264] : memref<2x32xf32, #tpu.memory_space<vmem>>, vector<2x32xf32>
    tpu.vector_store %arg12[%c0_263, %c0_264], %541 {strides = array<i32>} : memref<2x32xf32, #tpu.memory_space<vmem>>, vector<2x32xf32>,
    %c0_265 = arith.constant 0 : index
    %c0_266 = arith.constant 0 : index
    %544 = vector.load %arg12[%c0_265, %c0_266] : memref<2x32xf32, #tpu.memory_space<vmem>>, vector<2x32xf32>
    %c0_267 = arith.constant 0 : index
    %c0_268 = arith.constant 0 : index
    %545 = vector.load %arg7[%c0_267, %c0_268] : memref<32x24xf32, #tpu.memory_space<vmem>>, vector<32x24xf32>
    %cst_269 = arith.constant dense<0.000000e+00> : vector<2x24xf32>
    %546 = tpu.matmul %544, %545, %cst_269 {dimension_numbers = #tpu.dot_dimension_numbers<[1], [0], [0], [1], [0, 0, 1, 1], [], []>} : vector<2x32xf32>, vector<32x24xf32>, vector<2x24xf32> -> vector<2x24xf32>
    %c0_270 = arith.constant 0 : index
    %c0_271 = arith.constant 0 : index
    %547 = vector.load %arg8[%c0_270, %c0_271] : memref<1x24xf32, #tpu.memory_space<vmem>>, vector<1x24xf32>
    %548 = vector.broadcast %547 : vector<1x24xf32> to vector<2x24xf32>
    %549 = arith.addf %546, %548 : vector<2x24xf32>
    %c0_272 = arith.constant 0 : index
    %c0_273 = arith.constant 0 : index
    %550 = vector.load %arg9[%c0_272, %c0_273] : memref<2x24xf32, #tpu.memory_space<vmem>>, vector<2x24xf32>
    tpu.vector_store %arg9[%c0_272, %c0_273], %549 {strides = array<i32>} : memref<2x24xf32, #tpu.memory_space<vmem>>, vector<2x24xf32>,
    return
  }
}

</mosaic_0001>

<bundles_post_ra>
// kernel: rnn_model_forward.1
= control target key start
LH: loop header
LB: loop body
LE: loop exit
PB: predicated region body
PF: predicated region fallthrough
CT: control target
= control target key end

     0   :  { %14 = vsyncpa [#allocation7], 0  ;;  %s2015_s0 = inlined_call_operand.vmem [shape: f32[16,16], index: 0, kind: input, shape index: {}]   ;;  %s2016_s1 = inlined_call_operand.hbm [shape: f32[16,128], index: 1, kind: input, shape index: {}]   ;;  %s2017_s2 = inlined_call_operand.vmem [shape: f32[32,128], index: 2, kind: input, shape index: {}]   ;;  %s2018_s3 = inlined_call_operand.vmem [shape: f32[1,128], index: 3, kind: input, shape index: {}]   ;;  %s2019_s4 = inlined_call_operand.vmem [shape: f32[32,128], index: 4, kind: input, shape index: {}]   ;;  %s2020_s5 = inlined_call_operand.hbm [shape: f32[32,128], index: 5, kind: input, shape index: {}]   ;;  %s2021_s6 = inlined_call_operand.vmem [shape: f32[1,128], index: 6, kind: input, shape index: {}]   ;;  %s2022_s7 = inlined_call_operand.vmem [shape: f32[32,24], index: 7, kind: input, shape index: {}]   ;;  %s2023_s8 = inlined_call_operand.vmem [shape: f32[1,24], index: 8, kind: input, shape index: {}]   ;;  %s2024_s9 = inlined_call_operand.hbm [shape: f32[2,24], index: 9, kind: output, shape index: {}]  }
   0x1   :  { %15 = vsyncpa [#allocation10], 0 }
   0x2   :  { %16 = vsyncpa [#allocation8], 0  ;;  %s23_s11 = sshll.u32 %s2016_s1, 4  ;;  %s1723_s12 = smov [#allocation6]   ;;  %s24_s11 = int_to_ptr.hbm [resolvable:$true] %s23_s11 }
   0x3   :  { %s25_s13 = sshll.u32 %s1723_s12, 4  ;;  %s42_s16 = sshll.u32 %s2020_s5, 4  ;;  %s26_s13 = int_to_ptr.vmem [resolvable:$true] %s25_s13  ;;  %s43_s16 = int_to_ptr.hbm [resolvable:$true] %s42_s16 }
   0x4   :  { %s1724_s17 = smov 128   ;;  %s1725_s18 = smov 8  }
   0x5   :  { %31 = dma.hbm_to_vmem [thread:$0]  %s24_s11, 256, %s26_s13, [#allocation7], %s1724_s17, %s1724_s17, %s1725_s18  }
   0x6   :  { %s1726_s19 = smov [#allocation9]  }
   0x7   :  { %s44_s20 = sshll.u32 %s1726_s19, 4  ;;  %s45_s20 = int_to_ptr.vmem [resolvable:$true] %s44_s20 }
   0x8   :  { %50 = dma.hbm_to_vmem [thread:$0]  %s43_s16, 512, %s45_s20, [#allocation10], %s1724_s17, %s1724_s17, %s1725_s18  }
   0x9   :  { %1717 = dma.done.wait [#allocation7], 256  }
   0xa   :  { %1718 = vsyncadd [#allocation7], 4294967040 }
   0xb   :  { %1719 = dma.done.wait [#allocation10], 512  }
   0xc   :  { %1720 = vsyncadd [#allocation10], 4294966784  ;;  %vm109_vm0 = vcmask 254976   ;;  %v1727_v0 = vmov 0.0   ;;  %v68_v1 = vld [vmem:[#allocation6 + $0x8] sm:$0xff]  ;;  %v67_v2 = vld [vmem:[#allocation6] sm:$0xff] }
   0xd   :  { %110 = vst.msk [vmem:[#allocation4] sm:$0x3] %vm109_vm0, %v1727_v0  ;;  %94 = vmatpush.msra.mxu0 %v68_v1  ;;  %v65_v3 = vld [vmem:[%s2015_s0] sm:$0xff]  ;;  %vm73_vm1 = vcmask 130048   ;;  %v108_v4 = vld [vmem:[%s2017_s2 + $0x18] sm:$0xff]  ;;  %v107_v5 = vld [vmem:[%s2017_s2 + $0x10] sm:$0xff] }
   0xe   :  { %111 = vst.msk [vmem:[#allocation5] sm:$0x3] %vm109_vm0, %v1727_v0  ;;  %130 = vmatpush.msra.mxu1 %v108_v4  ;;  %209 = vmatpush.msra.mxu2 %v108_v4  ;;  %v106_v6 = vld [vmem:[%s2017_s2 + $0x8] sm:$0xff]  ;;  %v105_v7 = vld [vmem:[%s2017_s2] sm:$0xff]  ;;  %vm114_vm2 = vcmask 261120   ;;  %s1728_s30 = smov 64  }
   0xf   :  { %95 = vmatpush.msra.mxu0 %v67_v2  ;;  %288 = vmatpush.msra.mxu3 %v108_v4  ;;  %v1812_v9 = vld [vmem:[%s2018_s3] ss:$0 sm:$0xff]  ;;  %s1729_s10 = smov 32   ;;  %s1730_s3 = smov 96  }
  0x10   :  { %1468 = vmatmul.msk.f32.vlgmr.msra.gmra.mxu0 %vm73_vm1, %v65_v3  ;;  %131 = vmatpush.msra.mxu1 %v107_v5  ;;  %s1731_s28 = smov [#allocation11]  }
  0x11   :  { %210 = vmatpush.msra.mxu2 %v107_v5  ;;  %289 = vmatpush.msra.mxu3 %v107_v5  ;;  %s1455_s2 = sshll.u32 %s1731_s28, 4  ;;  %s1456_s2 = int_to_ptr.vmem [resolvable:$true] %s1455_s2 }
  0x12   :  { %132 = vmatpush.msra.mxu1 %v106_v6  ;;  %604 = vmatpush.msrb.mxu0 %v108_v4 }
  0x13   :  { %211 = vmatpush.msra.mxu2 %v106_v6  ;;  %290 = vmatpush.msra.mxu3 %v106_v6 }
  0x14   :  { %v113_v8 = vld [vmem:[#allocation4] sm:$0x3]  ;;  %133 = vmatpush.msra.mxu1 %v105_v7  ;;  %605 = vmatpush.msrb.mxu0 %v107_v5 }
  0x15   :  { %1470 = vmatmul.msk.f32.vlgmr.msra.gmra.mxu1 %vm114_vm2, %v113_v8  ;;  %212 = vmatpush.msra.mxu2 %v105_v7  ;;  %v159_v16 = vld [vmem:[#allocation5] sm:$0x3] }
  0x16   :  { %291 = vmatpush.msra.mxu3 %v105_v7  ;;  %367 = vmatpush.msrb.mxu1 %v108_v4 }
  0x17   :  { %446 = vmatpush.msrb.mxu2 %v108_v4  ;;  %606 = vmatpush.msrb.mxu0 %v106_v6 }
  0x18   :  { %525 = vmatpush.msrb.mxu3 %v108_v4  ;;  %368 = vmatpush.msrb.mxu1 %v107_v5 }
  0x19   :  { %447 = vmatpush.msrb.mxu2 %v107_v5  ;;  %607 = vmatpush.msrb.mxu0 %v105_v7 }
  0x1a   :  { %526 = vmatpush.msrb.mxu3 %v107_v5  ;;  %369 = vmatpush.msrb.mxu1 %v106_v6 }
  0x1b   :  { %448 = vmatpush.msrb.mxu2 %v106_v6 }
  0x1c   :  { %527 = vmatpush.msrb.mxu3 %v106_v6  ;;  %370 = vmatpush.msrb.mxu1 %v105_v7 }
  0x1d   :  { %449 = vmatpush.msrb.mxu2 %v105_v7 }
  0x1e   :  { %528 = vmatpush.msrb.mxu3 %v105_v7  ;;  %683 = vmatpush.msra.mxu1 %v108_v4 }
  0x20   :  { %684 = vmatpush.msra.mxu1 %v107_v5 }
  0x22   :  { %685 = vmatpush.msra.mxu1 %v106_v6 }
  0x24   :  { %686 = vmatpush.msra.mxu1 %v105_v7 }
  0x8d   :  { %v97_v10 = vpop.f32.mrf.mxu0 }
  0x8e   :  { %v98_v11 = vadd.f32 %v1812_v9, %v97_v10 }
  0x90   :  { %103 = vst [vmem:[#allocation2] sm:$0xff] %v98_v11 }
  0x92   :  { %v135_v12 = vpop.f32.mrf.mxu1 }
  0x97   :  { %v112_v13 = vld [vmem:[#allocation2] sm:$0x3]  ;;  %v192_v43 = vld [vmem:[#allocation2 + $0x2] sm:$0x3]  ;;  %v271_v11 = vld [vmem:[#allocation2 + $0x4] sm:$0x3] }
  0x98   :  { %v138_v14 = vadd.f32 %v135_v12, %v112_v13 }
  0x9a   :  { %1517 = vtanh.f32 %v138_v14  ;;  %v1471_v17 = vmul.f32 -1.442695, %v138_v14 }
  0x9c   :  { %1519 = vpow2.f32 %v1471_v17 }
  0xa0   :  { %v1518_v15 = vpop.eup %1517 }
  0xa1   :  { %166 = vrot.lane.b32.xlu0 %v1518_v15, %s1728_s30 }
  0xa2   :  { %v1520_v18 = vpop.eup %1519 }
  0xa3   :  { %v142_v19 = vadd.f32 1.0, %v1520_v18 }
  0xa5   :  { %1521 = vrcp.f32 %v142_v19  ;;  %v154_v25 = vand.u32 2147483648, %v142_v19  ;;  %vm148_vm4 = vweird.f32 %v142_v19  ;;  %v152_v26 = vand.u32 2147483647, %v142_v19 }
  0xa7   :  { %v155_v28 = vor.u32 1.1754944e-38, %v154_v25  ;;  %vm153_vm6 = vcmp.eq.f32.partialorder %v152_v26, 8.507059e+37 }
  0xa9   :  { %161 = vrot.lane.b32.xlu0 %v159_v16, %s1729_s10 }
  0xab   :  { %v1522_v20 = vpop.eup %1521 }
  0xac   :  { %v144_v21 = vmul.f32 %v1522_v20, %v142_v19  ;;  %vm149_vm3 = vweird.f32 %v1522_v20 }
  0xad   :  { %vm150_vm5 = vmor %vm148_vm4, %vm149_vm3 }
  0xae   :  { %v145_v22 = vsub.f32 1.0, %v144_v21 }
  0xb0   :  { %v146_v23 = vmul.f32 %v1522_v20, %v145_v22 }
  0xb2   :  { %v147_v24 = vadd.f32 %v1522_v20, %v146_v23 }
  0xb4   :  { %v151_v27 = vsel %vm150_vm5, %v1522_v20, %v147_v24 }
  0xb5   :  { %v156_v30 = vsel %vm153_vm6, %v155_v28, %v151_v27 }
 0x113   :  { %v167_v29 = vpop.permute.xlu0 %166 }
 0x114   :  { %v169_v31 = vmul.f32 %v167_v29, %v156_v30 }
 0x116   :  { %171 = vrot.lane.b32.xlu1 %v169_v31, %s1729_s10 }
 0x11b   :  { %v162_v32 = vpop.permute.xlu0 %161 }
 0x11c   :  { %v164_v33 = vmul.f32 %v162_v32, %v156_v30 }
 0x188   :  { %v172_v34 = vpop.permute.xlu1 %171 }
 0x189   :  { %v174_v35 = vadd.f32 %v172_v34, %v164_v33 }
 0x18b   :  { %1523 = vtanh.f32 %v174_v35 }
 0x191   :  { %v1524_v36 = vpop.eup %1523 }
 0x192   :  { %177 = vrot.lane.b32.xlu1 %v1524_v36, %s1728_s30 }
 0x204   :  { %v178_v37 = vpop.permute.xlu1 %177 }
 0x205   :  { %v180_v38 = vmul.f32 %v178_v37, %v156_v30 }
 0x207   :  { %187 = vrot.lane.b32.xlu2 %v180_v38, %s1729_s10 }
 0x20f   :  { %182 = vrot.lane.b32.xlu2 %v174_v35, %s1730_s3 }
 0x261   :  { %v188_v39 = vpop.permute.xlu2 %187 }
 0x262   :  { %190 = vst.msk [vmem:[#allocation4] sm:$0x3] %vm109_vm0, %v188_v39 }
 0x263   :  { %191 = vst.msk [vmem:[#allocation3] sm:$0x3] %vm109_vm0, %v188_v39 }
 0x269   :  { %v193_v40 = vld [vmem:[#allocation4] sm:$0x3]  ;;  %v183_v41 = vpop.permute.xlu2 %182 }
 0x26a   :  { %185 = vst.msk [vmem:[#allocation5] sm:$0x3] %vm109_vm0, %v183_v41  ;;  %1472 = vmatmul.msk.f32.vlgmr.msra.gmra.mxu2 %vm114_vm2, %v193_v40  ;;  %v350_v41 = vld [vmem:[#allocation2 + $0x6] sm:$0x3] }
 0x271   :  { %v238_v42 = vld [vmem:[#allocation5] sm:$0x3] }
 0x272   :  { %240 = vrot.lane.b32.xlu1 %v238_v42, %s1729_s10 }
 0x2e4   :  { %v241_v62 = vpop.permute.xlu1 %240 }
 0x2ed   :  { %v214_v44 = vpop.f32.mrf.mxu2 }
 0x2ee   :  { %v217_v45 = vadd.f32 %v214_v44, %v192_v43 }
 0x2f0   :  { %1525 = vtanh.f32 %v217_v45  ;;  %v1473_v47 = vmul.f32 -1.442695, %v217_v45 }
 0x2f2   :  { %1527 = vpow2.f32 %v1473_v47 }
 0x2f6   :  { %v1526_v46 = vpop.eup %1525 }
 0x2f7   :  { %245 = vrot.lane.b32.xlu0 %v1526_v46, %s1728_s30 }
 0x2f8   :  { %v1528_v48 = vpop.eup %1527 }
 0x2f9   :  { %v221_v49 = vadd.f32 1.0, %v1528_v48 }
 0x2fb   :  { %1529 = vrcp.f32 %v221_v49  ;;  %v233_v55 = vand.u32 2147483648, %v221_v49  ;;  %vm227_vm8 = vweird.f32 %v221_v49  ;;  %v231_v56 = vand.u32 2147483647, %v221_v49 }
 0x2fd   :  { %v234_v58 = vor.u32 1.1754944e-38, %v233_v55  ;;  %vm232_vm10 = vcmp.eq.f32.partialorder %v231_v56, 8.507059e+37 }
 0x301   :  { %v1530_v50 = vpop.eup %1529 }
 0x302   :  { %v223_v51 = vmul.f32 %v1530_v50, %v221_v49  ;;  %vm228_vm7 = vweird.f32 %v1530_v50 }
 0x303   :  { %vm229_vm9 = vmor %vm227_vm8, %vm228_vm7 }
 0x304   :  { %v224_v52 = vsub.f32 1.0, %v223_v51 }
 0x306   :  { %v225_v53 = vmul.f32 %v1530_v50, %v224_v52 }
 0x308   :  { %v226_v54 = vadd.f32 %v1530_v50, %v225_v53 }
 0x30a   :  { %v230_v57 = vsel %vm229_vm9, %v1530_v50, %v226_v54 }
 0x30b   :  { %v235_v60 = vsel %vm232_vm10, %v234_v58, %v230_v57 }
 0x30c   :  { %v243_v63 = vmul.f32 %v241_v62, %v235_v60 }
 0x369   :  { %v246_v59 = vpop.permute.xlu0 %245 }
 0x36a   :  { %v248_v61 = vmul.f32 %v246_v59, %v235_v60 }
 0x36c   :  { %250 = vrot.lane.b32.xlu2 %v248_v61, %s1729_s10 }
 0x3c6   :  { %v251_v1 = vpop.permute.xlu2 %250 }
 0x3c7   :  { %v253_v2 = vadd.f32 %v251_v1, %v243_v63 }
 0x3c9   :  { %1531 = vtanh.f32 %v253_v2  ;;  %261 = vrot.lane.b32.xlu2 %v253_v2, %s1730_s3 }
 0x3cf   :  { %v1532_v3 = vpop.eup %1531 }
 0x3d0   :  { %256 = vrot.lane.b32.xlu0 %v1532_v3, %s1728_s30 }
 0x423   :  { %v262_v4 = vpop.permute.xlu2 %261 }
 0x424   :  { %264 = vst.msk [vmem:[#allocation5] sm:$0x3] %vm109_vm0, %v262_v4 }
 0x42b   :  { %v317_v7 = vld [vmem:[#allocation5] sm:$0x3] }
 0x442   :  { %v257_v5 = vpop.permute.xlu0 %256 }
 0x443   :  { %v259_v6 = vmul.f32 %v257_v5, %v235_v60 }
 0x445   :  { %266 = vrot.lane.b32.xlu1 %v259_v6, %s1729_s10  ;;  %v66_v6 = vld [vmem:[%s2015_s0 + $0x8] sm:$0xff] }
 0x446   :  { %1469 = vmatmul.msk.f32.gmra.mxu0 %vm73_vm1, %v66_v6 }
 0x44d   :  { %319 = vrot.lane.b32.xlu1 %v317_v7, %s1729_s10  ;;  %v750_v7 = vld [vmem:[%s2019_s4 + $0x18] sm:$0xff] }
 0x44e   :  { %773 = vmatpush.msra.mxu2 %v750_v7 }
 0x4b7   :  { %v267_v8 = vpop.permute.xlu1 %266 }
 0x4b8   :  { %269 = vst.msk [vmem:[#allocation4] sm:$0x3] %vm109_vm0, %v267_v8 }
 0x4b9   :  { %270 = vst.msk [vmem:[#allocation3 + $0x2] sm:$0x3] %vm109_vm0, %v267_v8  ;;  %v749_v8 = vld [vmem:[%s2019_s4 + $0x10] sm:$0xff] }
 0x4ba   :  { %774 = vmatpush.msra.mxu2 %v749_v8 }
 0x4bf   :  { %v272_v10 = vld [vmem:[#allocation4] sm:$0x3]  ;;  %v320_v30 = vpop.permute.xlu1 %319 }
 0x4c0   :  { %1474 = vmatmul.msk.f32.vlgmr.msra.gmra.mxu3 %vm114_vm2, %v272_v10  ;;  %v748_v10 = vld [vmem:[%s2019_s4 + $0x8] sm:$0xff] }
 0x4c1   :  { %775 = vmatpush.msra.mxu2 %v748_v10 }
 0x543   :  { %v293_v12 = vpop.f32.mrf.mxu3 }
 0x544   :  { %v296_v13 = vadd.f32 %v293_v12, %v271_v11  ;;  %v747_v11 = vld [vmem:[%s2019_s4] sm:$0xff] }
 0x545   :  { %776 = vmatpush.msra.mxu2 %v747_v11 }
 0x546   :  { %1533 = vtanh.f32 %v296_v13  ;;  %v1475_v15 = vmul.f32 -1.442695, %v296_v13 }
 0x548   :  { %1535 = vpow2.f32 %v1475_v15  ;;  %v100_v15 = vpop.f32.mrf.mxu0 }
 0x54c   :  { %v1534_v14 = vpop.eup %1533 }
 0x54d   :  { %324 = vrot.lane.b32.xlu0 %v1534_v14, %s1728_s30 }
 0x54e   :  { %v1536_v16 = vpop.eup %1535 }
 0x54f   :  { %v300_v17 = vadd.f32 1.0, %v1536_v16  ;;  %v101_v16 = vadd.f32 %v1812_v9, %v100_v15 }
 0x551   :  { %1537 = vrcp.f32 %v300_v17  ;;  %v312_v23 = vand.u32 2147483648, %v300_v17  ;;  %vm306_vm12 = vweird.f32 %v300_v17  ;;  %v310_v24 = vand.u32 2147483647, %v300_v17  ;;  %104 = vst [vmem:[#allocation2 + $0x8] sm:$0xff] %v101_v16 }
 0x553   :  { %v313_v26 = vor.u32 1.1754944e-38, %v312_v23  ;;  %vm311_vm14 = vcmp.eq.f32.partialorder %v310_v24, 8.507059e+37 }
 0x557   :  { %v1538_v18 = vpop.eup %1537 }
 0x558   :  { %v302_v19 = vmul.f32 %v1538_v18, %v300_v17  ;;  %vm307_vm11 = vweird.f32 %v1538_v18  ;;  %v429_v17 = vld [vmem:[#allocation2 + $0x8] sm:$0x3] }
 0x559   :  { %vm308_vm13 = vmor %vm306_vm12, %vm307_vm11 }
 0x55a   :  { %v303_v20 = vsub.f32 1.0, %v302_v19 }
 0x55c   :  { %v304_v21 = vmul.f32 %v1538_v18, %v303_v20  ;;  %v1877_v20 = vld [vmem:[%s2021_s6] ss:$0 sm:$0xff] }
 0x55e   :  { %v305_v22 = vadd.f32 %v1538_v18, %v304_v21 }
 0x560   :  { %v309_v25 = vsel %vm308_vm13, %v1538_v18, %v305_v22 }
 0x561   :  { %v314_v28 = vsel %vm311_vm14, %v313_v26, %v309_v25 }
 0x562   :  { %v322_v31 = vmul.f32 %v320_v30, %v314_v28 }
 0x5bf   :  { %v325_v27 = vpop.permute.xlu0 %324 }
 0x5c0   :  { %v327_v29 = vmul.f32 %v325_v27, %v314_v28 }
 0x5c2   :  { %329 = vrot.lane.b32.xlu2 %v327_v29, %s1729_s10 }
 0x61c   :  { %v330_v32 = vpop.permute.xlu2 %329 }
 0x61d   :  { %v332_v33 = vadd.f32 %v330_v32, %v322_v31 }
 0x61f   :  { %1539 = vtanh.f32 %v332_v33  ;;  %340 = vrot.lane.b32.xlu2 %v332_v33, %s1730_s3 }
 0x625   :  { %v1540_v34 = vpop.eup %1539 }
 0x626   :  { %335 = vrot.lane.b32.xlu0 %v1540_v34, %s1728_s30 }
 0x679   :  { %v341_v35 = vpop.permute.xlu2 %340 }
 0x67a   :  { %343 = vst.msk [vmem:[#allocation5] sm:$0x3] %vm109_vm0, %v341_v35 }
 0x681   :  { %v396_v38 = vld [vmem:[#allocation5] sm:$0x3] }
 0x698   :  { %v336_v36 = vpop.permute.xlu0 %335 }
 0x699   :  { %v338_v37 = vmul.f32 %v336_v36, %v314_v28 }
 0x69b   :  { %345 = vrot.lane.b32.xlu1 %v338_v37, %s1729_s10 }
 0x6a3   :  { %398 = vrot.lane.b32.xlu1 %v396_v38, %s1729_s10 }
 0x70d   :  { %v346_v39 = vpop.permute.xlu1 %345 }
 0x70e   :  { %348 = vst.msk [vmem:[#allocation4] sm:$0x3] %vm109_vm0, %v346_v39 }
 0x70f   :  { %349 = vst.msk [vmem:[#allocation3 + $0x4] sm:$0x3] %vm109_vm0, %v346_v39 }
 0x715   :  { %v351_v40 = vld [vmem:[#allocation4] sm:$0x3]  ;;  %v399_v60 = vpop.permute.xlu1 %398 }
 0x716   :  { %1476 = vmatmul.msk.f32.vlgmr.msrb.gmra.mxu1 %vm114_vm2, %v351_v40 }
 0x793   :  { %v372_v42 = vpop.f32.mrf.mxu1 }
 0x794   :  { %v375_v43 = vadd.f32 %v372_v42, %v350_v41 }
 0x796   :  { %1541 = vtanh.f32 %v375_v43  ;;  %v1477_v45 = vmul.f32 -1.442695, %v375_v43 }
 0x798   :  { %1543 = vpow2.f32 %v1477_v45 }
 0x79c   :  { %v1542_v44 = vpop.eup %1541 }
 0x79d   :  { %403 = vrot.lane.b32.xlu0 %v1542_v44, %s1728_s30 }
 0x79e   :  { %v1544_v46 = vpop.eup %1543 }
 0x79f   :  { %v379_v47 = vadd.f32 1.0, %v1544_v46 }
 0x7a1   :  { %1545 = vrcp.f32 %v379_v47  ;;  %v391_v53 = vand.u32 2147483648, %v379_v47  ;;  %vm385_vm3 = vweird.f32 %v379_v47  ;;  %v389_v54 = vand.u32 2147483647, %v379_v47 }
 0x7a3   :  { %v392_v56 = vor.u32 1.1754944e-38, %v391_v53  ;;  %vm390_vm5 = vcmp.eq.f32.partialorder %v389_v54, 8.507059e+37 }
 0x7a7   :  { %v1546_v48 = vpop.eup %1545 }
 0x7a8   :  { %v381_v49 = vmul.f32 %v1546_v48, %v379_v47  ;;  %vm386_vm15 = vweird.f32 %v1546_v48 }
 0x7a9   :  { %vm387_vm4 = vmor %vm385_vm3, %vm386_vm15 }
 0x7aa   :  { %v382_v50 = vsub.f32 1.0, %v381_v49  ;;  %v508_v49 = vld [vmem:[#allocation2 + $0xa] sm:$0x3] }
 0x7ac   :  { %v383_v51 = vmul.f32 %v1546_v48, %v382_v50 }
 0x7ae   :  { %v384_v52 = vadd.f32 %v1546_v48, %v383_v51 }
 0x7b0   :  { %v388_v55 = vsel %vm387_vm4, %v1546_v48, %v384_v52 }
 0x7b1   :  { %v393_v58 = vsel %vm390_vm5, %v392_v56, %v388_v55 }
 0x7b2   :  { %v401_v61 = vmul.f32 %v399_v60, %v393_v58 }
 0x80f   :  { %v404_v57 = vpop.permute.xlu0 %403 }
 0x810   :  { %v406_v59 = vmul.f32 %v404_v57, %v393_v58 }
 0x812   :  { %408 = vrot.lane.b32.xlu2 %v406_v59, %s1729_s10 }
 0x86c   :  { %v409_v62 = vpop.permute.xlu2 %408 }
 0x86d   :  { %v411_v63 = vadd.f32 %v409_v62, %v401_v61 }
 0x86f   :  { %1547 = vtanh.f32 %v411_v63  ;;  %419 = vrot.lane.b32.xlu2 %v411_v63, %s1730_s3 }
 0x875   :  { %v1548_v1 = vpop.eup %1547 }
 0x876   :  { %414 = vrot.lane.b32.xlu0 %v1548_v1, %s1728_s30 }
 0x8c9   :  { %v420_v2 = vpop.permute.xlu2 %419 }
 0x8ca   :  { %422 = vst.msk [vmem:[#allocation5] sm:$0x3] %vm109_vm0, %v420_v2 }
 0x8d1   :  { %v475_v5 = vld [vmem:[#allocation5] sm:$0x3] }
 0x8e8   :  { %v415_v3 = vpop.permute.xlu0 %414 }
 0x8e9   :  { %v417_v4 = vmul.f32 %v415_v3, %v393_v58 }
 0x8eb   :  { %424 = vrot.lane.b32.xlu1 %v417_v4, %s1729_s10 }
 0x8f3   :  { %477 = vrot.lane.b32.xlu1 %v475_v5, %s1729_s10 }
 0x95d   :  { %v425_v12 = vpop.permute.xlu1 %424 }
 0x95e   :  { %427 = vst.msk [vmem:[#allocation4] sm:$0x3] %vm109_vm0, %v425_v12 }
 0x95f   :  { %428 = vst.msk [vmem:[#allocation3 + $0x6] sm:$0x3] %vm109_vm0, %v425_v12 }
 0x965   :  { %v430_v13 = vld [vmem:[#allocation4] sm:$0x3]  ;;  %v478_v38 = vpop.permute.xlu1 %477 }
 0x966   :  { %1478 = vmatmul.msk.f32.vlgmr.msrb.gmra.mxu2 %vm114_vm2, %v430_v13  ;;  %v745_v14 = vld [vmem:[#allocation3] sm:$0xff] }
 0x96e   :  { %1486 = vmatmul.msk.f32.vlgmr.msra.gmra.mxu2 %vm114_vm2, %v745_v14 }
 0x9e9   :  { %v451_v18 = vpop.f32.mrf.mxu2 }
 0x9ea   :  { %v454_v19 = vadd.f32 %v451_v18, %v429_v17  ;;  %v587_v17 = vld [vmem:[#allocation2 + $0xc] sm:$0x3] }
 0x9ec   :  { %1549 = vtanh.f32 %v454_v19  ;;  %v1479_v24 = vmul.f32 -1.442695, %v454_v19 }
 0x9ee   :  { %1551 = vpow2.f32 %v1479_v24 }
 0x9f1   :  { %v778_v21 = vpop.f32.mrf.mxu2 }
 0x9f2   :  { %v1550_v22 = vpop.eup %1549  ;;  %v779_v23 = vadd.f32 %v1877_v20, %v778_v21 }
 0x9f3   :  { %482 = vrot.lane.b32.xlu0 %v1550_v22, %s1728_s30 }
 0x9f4   :  { %784 = vst [vmem:[#allocation2] sm:$0xff] %v779_v23  ;;  %v1552_v9 = vpop.eup %1551 }
 0x9f5   :  { %v458_v25 = vadd.f32 1.0, %v1552_v9 }
 0x9f7   :  { %1553 = vrcp.f32 %v458_v25  ;;  %v470_v31 = vand.u32 2147483648, %v458_v25  ;;  %vm464_vm6 = vweird.f32 %v458_v25  ;;  %v468_v32 = vand.u32 2147483647, %v458_v25 }
 0x9f9   :  { %v471_v34 = vor.u32 1.1754944e-38, %v470_v31  ;;  %vm469_vm8 = vcmp.eq.f32.partialorder %v468_v32, 8.507059e+37 }
 0x9fd   :  { %v1554_v26 = vpop.eup %1553 }
 0x9fe   :  { %v460_v27 = vmul.f32 %v1554_v26, %v458_v25  ;;  %vm465_vm1 = vweird.f32 %v1554_v26 }
 0x9ff   :  { %vm466_vm7 = vmor %vm464_vm6, %vm465_vm1 }
 0xa00   :  { %v461_v28 = vsub.f32 1.0, %v460_v27 }
 0xa02   :  { %v462_v29 = vmul.f32 %v1554_v26, %v461_v28 }
 0xa04   :  { %v463_v30 = vadd.f32 %v1554_v26, %v462_v29 }
 0xa06   :  { %v467_v33 = vsel %vm466_vm7, %v1554_v26, %v463_v30 }
 0xa07   :  { %v472_v36 = vsel %vm469_vm8, %v471_v34, %v467_v33 }
 0xa08   :  { %v480_v39 = vmul.f32 %v478_v38, %v472_v36 }
 0xa65   :  { %v483_v35 = vpop.permute.xlu0 %482 }
 0xa66   :  { %v485_v37 = vmul.f32 %v483_v35, %v472_v36 }
 0xa68   :  { %487 = vrot.lane.b32.xlu2 %v485_v37, %s1729_s10 }
 0xac2   :  { %v488_v40 = vpop.permute.xlu2 %487 }
 0xac3   :  { %v490_v41 = vadd.f32 %v488_v40, %v480_v39 }
 0xac5   :  { %1555 = vtanh.f32 %v490_v41  ;;  %498 = vrot.lane.b32.xlu2 %v490_v41, %s1730_s3 }
 0xacb   :  { %v1556_v42 = vpop.eup %1555 }
 0xacc   :  { %493 = vrot.lane.b32.xlu0 %v1556_v42, %s1728_s30 }
 0xb1f   :  { %v499_v43 = vpop.permute.xlu2 %498 }
 0xb20   :  { %501 = vst.msk [vmem:[#allocation5] sm:$0x3] %vm109_vm0, %v499_v43 }
 0xb27   :  { %v554_v46 = vld [vmem:[#allocation5] sm:$0x3] }
 0xb3e   :  { %v494_v44 = vpop.permute.xlu0 %493 }
 0xb3f   :  { %v496_v45 = vmul.f32 %v494_v44, %v472_v36 }
 0xb41   :  { %503 = vrot.lane.b32.xlu1 %v496_v45, %s1729_s10 }
 0xb49   :  { %556 = vrot.lane.b32.xlu1 %v554_v46, %s1729_s10 }
 0xbb3   :  { %v504_v47 = vpop.permute.xlu1 %503 }
 0xbb4   :  { %506 = vst.msk [vmem:[#allocation4] sm:$0x3] %vm109_vm0, %v504_v47 }
 0xbb5   :  { %507 = vst.msk [vmem:[#allocation3 + $0x8] sm:$0x3] %vm109_vm0, %v504_v47  ;;  %v666_v47 = vld [vmem:[#allocation2 + $0xe] sm:$0x3] }
 0xbbb   :  { %v509_v48 = vld [vmem:[#allocation4] sm:$0x3]  ;;  %v557_v5 = vpop.permute.xlu1 %556 }
 0xbbc   :  { %1480 = vmatmul.msk.f32.vlgmr.msrb.gmra.mxu3 %vm114_vm2, %v509_v48 }
 0xc3f   :  { %v530_v50 = vpop.f32.mrf.mxu3 }
 0xc40   :  { %v533_v51 = vadd.f32 %v530_v50, %v508_v49 }
 0xc42   :  { %1557 = vtanh.f32 %v533_v51  ;;  %v1481_v53 = vmul.f32 -1.442695, %v533_v51 }
 0xc44   :  { %1559 = vpow2.f32 %v1481_v53 }
 0xc48   :  { %v1558_v52 = vpop.eup %1557 }
 0xc49   :  { %561 = vrot.lane.b32.xlu0 %v1558_v52, %s1728_s30 }
 0xc4a   :  { %v1560_v54 = vpop.eup %1559 }
 0xc4b   :  { %v537_v55 = vadd.f32 1.0, %v1560_v54 }
 0xc4d   :  { %1561 = vrcp.f32 %v537_v55  ;;  %v549_v61 = vand.u32 2147483648, %v537_v55  ;;  %vm543_vm10 = vweird.f32 %v537_v55  ;;  %v547_v62 = vand.u32 2147483647, %v537_v55 }
 0xc4f   :  { %v550_v1 = vor.u32 1.1754944e-38, %v549_v61  ;;  %vm548_vm12 = vcmp.eq.f32.partialorder %v547_v62, 8.507059e+37 }
 0xc53   :  { %v1562_v56 = vpop.eup %1561 }
 0xc54   :  { %v539_v57 = vmul.f32 %v1562_v56, %v537_v55  ;;  %vm544_vm9 = vweird.f32 %v1562_v56 }
 0xc55   :  { %vm545_vm11 = vmor %vm543_vm10, %vm544_vm9 }
 0xc56   :  { %v540_v58 = vsub.f32 1.0, %v539_v57 }
 0xc58   :  { %v541_v59 = vmul.f32 %v1562_v56, %v540_v58 }
 0xc5a   :  { %v542_v60 = vadd.f32 %v1562_v56, %v541_v59 }
 0xc5c   :  { %v546_v63 = vsel %vm545_vm11, %v1562_v56, %v542_v60 }
 0xc5d   :  { %v551_v3 = vsel %vm548_vm12, %v550_v1, %v546_v63 }
 0xc5e   :  { %v559_v6 = vmul.f32 %v557_v5, %v551_v3 }
 0xcbb   :  { %v562_v2 = vpop.permute.xlu0 %561 }
 0xcbc   :  { %v564_v4 = vmul.f32 %v562_v2, %v551_v3 }
 0xcbe   :  { %566 = vrot.lane.b32.xlu2 %v564_v4, %s1729_s10 }
 0xd18   :  { %v567_v7 = vpop.permute.xlu2 %566 }
 0xd19   :  { %v569_v8 = vadd.f32 %v567_v7, %v559_v6 }
 0xd1b   :  { %1563 = vtanh.f32 %v569_v8  ;;  %577 = vrot.lane.b32.xlu2 %v569_v8, %s1730_s3 }
 0xd21   :  { %v1564_v10 = vpop.eup %1563 }
 0xd22   :  { %572 = vrot.lane.b32.xlu0 %v1564_v10, %s1728_s30 }
 0xd75   :  { %v578_v11 = vpop.permute.xlu2 %577 }
 0xd76   :  { %580 = vst.msk [vmem:[#allocation5] sm:$0x3] %vm109_vm0, %v578_v11 }
 0xd7d   :  { %v633_v14 = vld [vmem:[#allocation5] sm:$0x3] }
 0xd94   :  { %v573_v12 = vpop.permute.xlu0 %572 }
 0xd95   :  { %v575_v13 = vmul.f32 %v573_v12, %v551_v3  ;;  %v789_v12 = vld [vmem:[#allocation9 + $0x18] sm:$0xff] }
 0xd96   :  { %809 = vmatpush.msra.mxu3 %v789_v12  ;;  %887 = vmatpush.msra.mxu0 %v789_v12 }
 0xd97   :  { %582 = vrot.lane.b32.xlu1 %v575_v13, %s1729_s10  ;;  %v788_v13 = vld [vmem:[#allocation9 + $0x10] sm:$0xff]  ;;  %965 = vmatpush.msrb.mxu1 %v789_v12 }
 0xd98   :  { %1277 = vmatpush.msrb.mxu2 %v789_v12  ;;  %810 = vmatpush.msra.mxu3 %v788_v13 }
 0xd99   :  { %888 = vmatpush.msra.mxu0 %v788_v13  ;;  %966 = vmatpush.msrb.mxu1 %v788_v13 }
 0xd9a   :  { %1278 = vmatpush.msrb.mxu2 %v788_v13 }
 0xd9f   :  { %635 = vrot.lane.b32.xlu1 %v633_v14, %s1729_s10  ;;  %v787_v14 = vld [vmem:[#allocation9 + $0x8] sm:$0xff] }
 0xda0   :  { %811 = vmatpush.msra.mxu3 %v787_v14  ;;  %889 = vmatpush.msra.mxu0 %v787_v14 }
 0xda1   :  { %967 = vmatpush.msrb.mxu1 %v787_v14  ;;  %1279 = vmatpush.msrb.mxu2 %v787_v14 }
 0xe09   :  { %v583_v15 = vpop.permute.xlu1 %582 }
 0xe0a   :  { %585 = vst.msk [vmem:[#allocation4] sm:$0x3] %vm109_vm0, %v583_v15 }
 0xe0b   :  { %586 = vst.msk [vmem:[#allocation3 + $0xa] sm:$0x3] %vm109_vm0, %v583_v15  ;;  %v786_v15 = vld [vmem:[#allocation9] sm:$0xff] }
 0xe0c   :  { %812 = vmatpush.msra.mxu3 %v786_v15  ;;  %890 = vmatpush.msra.mxu0 %v786_v15 }
 0xe0d   :  { %968 = vmatpush.msrb.mxu1 %v786_v15  ;;  %1280 = vmatpush.msrb.mxu2 %v786_v15 }
 0xe0e   :  { %1043 = vmatpush.msrb.mxu3 %v789_v12 }
 0xe10   :  { %1044 = vmatpush.msrb.mxu3 %v788_v13 }
 0xe11   :  { %v588_v16 = vld [vmem:[#allocation4] sm:$0x3]  ;;  %v636_v36 = vpop.permute.xlu1 %635 }
 0xe12   :  { %1482 = vmatmul.msk.f32.vlgmr.msrb.gmra.mxu0 %vm114_vm2, %v588_v16  ;;  %1045 = vmatpush.msrb.mxu3 %v787_v14 }
 0xe13   :  { %1121 = vmatpush.msrb.mxu0 %v789_v12 }
 0xe14   :  { %1046 = vmatpush.msrb.mxu3 %v786_v15 }
 0xe15   :  { %1122 = vmatpush.msrb.mxu0 %v788_v13 }
 0xe17   :  { %1123 = vmatpush.msrb.mxu0 %v787_v14 }
 0xe19   :  { %1124 = vmatpush.msrb.mxu0 %v786_v15 }
 0xe8f   :  { %v609_v18 = vpop.f32.mrf.mxu0 }
 0xe90   :  { %v612_v19 = vadd.f32 %v609_v18, %v587_v17 }
 0xe92   :  { %1565 = vtanh.f32 %v612_v19  ;;  %v1483_v22 = vmul.f32 -1.442695, %v612_v19 }
 0xe94   :  { %1567 = vpow2.f32 %v1483_v22 }
 0xe98   :  { %v1566_v21 = vpop.eup %1565 }
 0xe99   :  { %640 = vrot.lane.b32.xlu0 %v1566_v21, %s1728_s30 }
 0xe9a   :  { %v1568_v23 = vpop.eup %1567 }
 0xe9b   :  { %v616_v24 = vadd.f32 1.0, %v1568_v23  ;;  %v792_v23 = vld [vmem:[#allocation2] sm:$0x3] }
 0xe9d   :  { %1569 = vrcp.f32 %v616_v24  ;;  %v628_v29 = vand.u32 2147483648, %v616_v24  ;;  %vm622_vm14 = vweird.f32 %v616_v24  ;;  %v626_v30 = vand.u32 2147483647, %v616_v24 }
 0xe9f   :  { %v629_v32 = vor.u32 1.1754944e-38, %v628_v29  ;;  %vm627_vm3 = vcmp.eq.f32.partialorder %v626_v30, 8.507059e+37 }
 0xea3   :  { %v1570_v9 = vpop.eup %1569 }
 0xea4   :  { %v618_v25 = vmul.f32 %v1570_v9, %v616_v24  ;;  %vm623_vm13 = vweird.f32 %v1570_v9 }
 0xea5   :  { %vm624_vm15 = vmor %vm622_vm14, %vm623_vm13 }
 0xea6   :  { %v619_v26 = vsub.f32 1.0, %v618_v25 }
 0xea8   :  { %v620_v27 = vmul.f32 %v1570_v9, %v619_v26 }
 0xeaa   :  { %v621_v28 = vadd.f32 %v1570_v9, %v620_v27 }
 0xeac   :  { %v625_v31 = vsel %vm624_vm15, %v1570_v9, %v621_v28 }
 0xead   :  { %v630_v34 = vsel %vm627_vm3, %v629_v32, %v625_v31 }
 0xeae   :  { %v638_v37 = vmul.f32 %v636_v36, %v630_v34 }
 0xf0b   :  { %v641_v33 = vpop.permute.xlu0 %640 }
 0xf0c   :  { %v643_v35 = vmul.f32 %v641_v33, %v630_v34 }
 0xf0e   :  { %645 = vrot.lane.b32.xlu2 %v643_v35, %s1729_s10 }
 0xf68   :  { %v646_v38 = vpop.permute.xlu2 %645 }
 0xf69   :  { %v648_v39 = vadd.f32 %v646_v38, %v638_v37 }
 0xf6b   :  { %1571 = vtanh.f32 %v648_v39  ;;  %656 = vrot.lane.b32.xlu2 %v648_v39, %s1730_s3 }
 0xf71   :  { %v1572_v40 = vpop.eup %1571 }
 0xf72   :  { %651 = vrot.lane.b32.xlu0 %v1572_v40, %s1728_s30 }
 0xfc5   :  { %v657_v41 = vpop.permute.xlu2 %656 }
 0xfc6   :  { %659 = vst.msk [vmem:[#allocation5] sm:$0x3] %vm109_vm0, %v657_v41 }
 0xfcd   :  { %v712_v44 = vld [vmem:[#allocation5] sm:$0x3] }
 0xfe4   :  { %v652_v42 = vpop.permute.xlu0 %651 }
 0xfe5   :  { %v654_v43 = vmul.f32 %v652_v42, %v630_v34 }
 0xfe7   :  { %661 = vrot.lane.b32.xlu1 %v654_v43, %s1729_s10 }
 0xfef   :  { %714 = vrot.lane.b32.xlu1 %v712_v44, %s1729_s10 }
0x1059   :  { %v662_v45 = vpop.permute.xlu1 %661 }
0x105a   :  { %664 = vst.msk [vmem:[#allocation4] sm:$0x3] %vm109_vm0, %v662_v45 }
0x105b   :  { %665 = vst.msk [vmem:[#allocation3 + $0xc] sm:$0x3] %vm109_vm0, %v662_v45 }
0x1061   :  { %v667_v46 = vld [vmem:[#allocation4] sm:$0x3]  ;;  %v715_v3 = vpop.permute.xlu1 %714 }
0x1062   :  { %1484 = vmatmul.msk.f32.vlgmr.msra.gmra.mxu1 %vm114_vm2, %v667_v46 }
0x1063   :  { %1199 = vmatpush.msra.mxu1 %v789_v12 }
0x1065   :  { %1200 = vmatpush.msra.mxu1 %v788_v13 }
0x1067   :  { %1201 = vmatpush.msra.mxu1 %v787_v14 }
0x1069   :  { %1202 = vmatpush.msra.mxu1 %v786_v15 }
0x10df   :  { %v688_v48 = vpop.f32.mrf.mxu1 }
0x10e0   :  { %v691_v49 = vadd.f32 %v688_v48, %v666_v47 }
0x10e2   :  { %1573 = vtanh.f32 %v691_v49  ;;  %v1485_v51 = vmul.f32 -1.442695, %v691_v49 }
0x10e4   :  { %1575 = vpow2.f32 %v1485_v51 }
0x10e8   :  { %v1574_v50 = vpop.eup %1573 }
0x10e9   :  { %719 = vrot.lane.b32.xlu0 %v1574_v50, %s1728_s30  ;;  %v870_v50 = vld [vmem:[#allocation2 + $0x2] sm:$0x3] }
0x10ea   :  { %v1576_v52 = vpop.eup %1575 }
0x10eb   :  { %v695_v53 = vadd.f32 1.0, %v1576_v52 }
0x10ed   :  { %1577 = vrcp.f32 %v695_v53  ;;  %v707_v59 = vand.u32 2147483648, %v695_v53  ;;  %vm701_vm5 = vweird.f32 %v695_v53  ;;  %v705_v60 = vand.u32 2147483647, %v695_v53 }
0x10ef   :  { %v708_v62 = vor.u32 1.1754944e-38, %v707_v59  ;;  %vm706_vm6 = vcmp.eq.f32.partialorder %v705_v60, 8.507059e+37 }
0x10f3   :  { %v1578_v54 = vpop.eup %1577 }
0x10f4   :  { %v697_v55 = vmul.f32 %v1578_v54, %v695_v53  ;;  %vm702_vm4 = vweird.f32 %v1578_v54 }
0x10f5   :  { %vm703_vm1 = vmor %vm701_vm5, %vm702_vm4 }
0x10f6   :  { %v698_v56 = vsub.f32 1.0, %v697_v55 }
0x10f8   :  { %v699_v57 = vmul.f32 %v1578_v54, %v698_v56 }
0x10fa   :  { %v700_v58 = vadd.f32 %v1578_v54, %v699_v57 }
0x10fc   :  { %v704_v61 = vsel %vm703_vm1, %v1578_v54, %v700_v58 }
0x10fd   :  { %v709_v1 = vsel %vm706_vm6, %v708_v62, %v704_v61 }
0x10fe   :  { %v717_v4 = vmul.f32 %v715_v3, %v709_v1 }
0x115b   :  { %v720_v63 = vpop.permute.xlu0 %719 }
0x115c   :  { %v722_v2 = vmul.f32 %v720_v63, %v709_v1 }
0x115e   :  { %724 = vrot.lane.b32.xlu2 %v722_v2, %s1729_s10 }
0x11b8   :  { %v725_v5 = vpop.permute.xlu2 %724 }
0x11b9   :  { %v727_v6 = vadd.f32 %v725_v5, %v717_v4 }
0x11bb   :  { %1579 = vtanh.f32 %v727_v6  ;;  %735 = vrot.lane.b32.xlu2 %v727_v6, %s1730_s3 }
0x11c1   :  { %v1580_v7 = vpop.eup %1579 }
0x11c2   :  { %730 = vrot.lane.b32.xlu0 %v1580_v7, %s1728_s30 }
0x1215   :  { %v736_v8 = vpop.permute.xlu2 %735 }
0x1216   :  { %738 = vst.msk [vmem:[#allocation5] sm:$0x3] %vm109_vm0, %v736_v8 }
0x1217   :  { %791 = vst.msk [vmem:[#allocation5] sm:$0x3] %vm109_vm0, %v1727_v0 }
0x121e   :  { %v838_v16 = vld [vmem:[#allocation5] sm:$0x3] }
0x1234   :  { %v731_v10 = vpop.permute.xlu0 %730 }
0x1235   :  { %v733_v11 = vmul.f32 %v731_v10, %v709_v1 }
0x1237   :  { %740 = vrot.lane.b32.xlu1 %v733_v11, %s1729_s10 }
0x123f   :  { %840 = vrot.lane.b32.xlu1 %v838_v16, %s1729_s10 }
0x12a9   :  { %v741_v17 = vpop.permute.xlu1 %740 }
0x12aa   :  { %743 = vst.msk [vmem:[#allocation4] sm:$0x3] %vm109_vm0, %v741_v17 }
0x12ab   :  { %744 = vst.msk [vmem:[#allocation3 + $0xe] sm:$0x3] %vm109_vm0, %v741_v17 }
0x12ac   :  { %790 = vst.msk [vmem:[#allocation4] sm:$0x3] %vm109_vm0, %v1727_v0 }
0x12b1   :  { %v841_v39 = vpop.permute.xlu1 %840 }
0x12b2   :  { %v746_v18 = vld [vmem:[#allocation3 + $0x8] sm:$0xff] }
0x12b3   :  { %1487 = vmatmul.msk.f32.gmra.mxu2 %vm114_vm2, %v746_v18  ;;  %v793_v19 = vld [vmem:[#allocation4] sm:$0x3]  ;;  %v948_v18 = vld [vmem:[#allocation2 + $0x4] sm:$0x3] }
0x12b4   :  { %1488 = vmatmul.msk.f32.vlgmr.msra.gmra.mxu3 %vm114_vm2, %v793_v19 }
0x12b5   :  { %1355 = vmatpush.msra.mxu3 %v789_v12 }
0x12b7   :  { %1356 = vmatpush.msra.mxu3 %v788_v13 }
0x12b9   :  { %1357 = vmatpush.msra.mxu3 %v787_v14 }
0x12bb   :  { %1358 = vmatpush.msra.mxu3 %v786_v15 }
0x1336   :  { %v781_v21 = vpop.f32.mrf.mxu2 }
0x1337   :  { %v782_v22 = vadd.f32 %v1877_v20, %v781_v21  ;;  %v814_v24 = vpop.f32.mrf.mxu3 }
0x1338   :  { %v817_v9 = vadd.f32 %v814_v24, %v792_v23 }
0x1339   :  { %785 = vst [vmem:[#allocation2 + $0x8] sm:$0xff] %v782_v22 }
0x133a   :  { %1581 = vtanh.f32 %v817_v9  ;;  %v1489_v0 = vmul.f32 -1.442695, %v817_v9 }
0x133c   :  { %1583 = vpow2.f32 %v1489_v0 }
0x1340   :  { %v1582_v25 = vpop.eup %1581 }
0x1341   :  { %845 = vrot.lane.b32.xlu0 %v1582_v25, %s1728_s30 }
0x1342   :  { %v1584_v26 = vpop.eup %1583 }
0x1343   :  { %v821_v27 = vadd.f32 1.0, %v1584_v26 }
0x1345   :  { %1585 = vrcp.f32 %v821_v27  ;;  %v833_v20 = vand.u32 2147483648, %v821_v27  ;;  %vm827_vm8 = vweird.f32 %v821_v27  ;;  %v831_v33 = vand.u32 2147483647, %v821_v27 }
0x1347   :  { %v834_v35 = vor.u32 1.1754944e-38, %v833_v20  ;;  %vm832_vm10 = vcmp.eq.f32.partialorder %v831_v33, 8.507059e+37 }
0x134b   :  { %v1586_v28 = vpop.eup %1585 }
0x134c   :  { %v823_v29 = vmul.f32 %v1586_v28, %v821_v27  ;;  %vm828_vm7 = vweird.f32 %v1586_v28 }
0x134d   :  { %vm829_vm9 = vmor %vm827_vm8, %vm828_vm7 }
0x134e   :  { %v824_v30 = vsub.f32 1.0, %v823_v29 }
0x1350   :  { %v825_v31 = vmul.f32 %v1586_v28, %v824_v30 }
0x1352   :  { %v826_v32 = vadd.f32 %v1586_v28, %v825_v31 }
0x1354   :  { %v830_v34 = vsel %vm829_vm9, %v1586_v28, %v826_v32 }
0x1355   :  { %v835_v36 = vsel %vm832_vm10, %v834_v35, %v830_v34 }
0x1356   :  { %v843_v40 = vmul.f32 %v841_v39, %v835_v36 }
0x13b3   :  { %v846_v37 = vpop.permute.xlu0 %845 }
0x13b4   :  { %v848_v38 = vmul.f32 %v846_v37, %v835_v36 }
0x13b6   :  { %850 = vrot.lane.b32.xlu2 %v848_v38, %s1729_s10 }
0x1410   :  { %v851_v41 = vpop.permute.xlu2 %850 }
0x1411   :  { %v853_v42 = vadd.f32 %v851_v41, %v843_v40 }
0x1413   :  { %1587 = vtanh.f32 %v853_v42  ;;  %861 = vrot.lane.b32.xlu2 %v853_v42, %s1730_s3 }
0x1419   :  { %v1588_v43 = vpop.eup %1587 }
0x141a   :  { %856 = vrot.lane.b32.xlu0 %v1588_v43, %s1728_s30 }
0x146d   :  { %v862_v44 = vpop.permute.xlu2 %861 }
0x146e   :  { %864 = vst.msk [vmem:[#allocation5] sm:$0x3] %vm109_vm0, %v862_v44 }
0x1475   :  { %v916_v47 = vld [vmem:[#allocation5] sm:$0x3] }
0x148c   :  { %v857_v45 = vpop.permute.xlu0 %856 }
0x148d   :  { %v859_v46 = vmul.f32 %v857_v45, %v835_v36 }
0x148f   :  { %866 = vrot.lane.b32.xlu1 %v859_v46, %s1729_s10  ;;  %v1026_v46 = vld [vmem:[#allocation2 + $0x6] sm:$0x3] }
0x1497   :  { %918 = vrot.lane.b32.xlu1 %v916_v47, %s1729_s10 }
0x1501   :  { %v867_v48 = vpop.permute.xlu1 %866 }
0x1502   :  { %869 = vst.msk [vmem:[#allocation4] sm:$0x3] %vm109_vm0, %v867_v48 }
0x1509   :  { %v871_v49 = vld [vmem:[#allocation4] sm:$0x3]  ;;  %v919_v6 = vpop.permute.xlu1 %918 }
0x150a   :  { %1490 = vmatmul.msk.f32.vlgmr.msra.gmra.mxu0 %vm114_vm2, %v871_v49 }
0x1587   :  { %v892_v51 = vpop.f32.mrf.mxu0 }
0x1588   :  { %v895_v52 = vadd.f32 %v892_v51, %v870_v50 }
0x158a   :  { %1589 = vtanh.f32 %v895_v52  ;;  %v1491_v54 = vmul.f32 -1.442695, %v895_v52 }
0x158c   :  { %1591 = vpow2.f32 %v1491_v54 }
0x1590   :  { %v1590_v53 = vpop.eup %1589 }
0x1591   :  { %923 = vrot.lane.b32.xlu0 %v1590_v53, %s1728_s30 }
0x1592   :  { %v1592_v55 = vpop.eup %1591 }
0x1593   :  { %v899_v56 = vadd.f32 1.0, %v1592_v55 }
0x1595   :  { %1593 = vrcp.f32 %v899_v56  ;;  %v911_v62 = vand.u32 2147483648, %v899_v56  ;;  %vm905_vm12 = vweird.f32 %v899_v56  ;;  %v909_v63 = vand.u32 2147483647, %v899_v56 }
0x1597   :  { %v912_v2 = vor.u32 1.1754944e-38, %v911_v62  ;;  %vm910_vm14 = vcmp.eq.f32.partialorder %v909_v63, 8.507059e+37 }
0x159b   :  { %v1594_v57 = vpop.eup %1593 }
0x159c   :  { %v901_v58 = vmul.f32 %v1594_v57, %v899_v56  ;;  %vm906_vm11 = vweird.f32 %v1594_v57 }
0x159d   :  { %vm907_vm13 = vmor %vm905_vm12, %vm906_vm11 }
0x159e   :  { %v902_v59 = vsub.f32 1.0, %v901_v58 }
0x15a0   :  { %v903_v60 = vmul.f32 %v1594_v57, %v902_v59 }
0x15a2   :  { %v904_v61 = vadd.f32 %v1594_v57, %v903_v60 }
0x15a4   :  { %v908_v1 = vsel %vm907_vm13, %v1594_v57, %v904_v61 }
0x15a5   :  { %v913_v4 = vsel %vm910_vm14, %v912_v2, %v908_v1 }
0x15a6   :  { %v921_v7 = vmul.f32 %v919_v6, %v913_v4 }
0x1603   :  { %v924_v3 = vpop.permute.xlu0 %923 }
0x1604   :  { %v926_v5 = vmul.f32 %v924_v3, %v913_v4 }
0x1606   :  { %928 = vrot.lane.b32.xlu2 %v926_v5, %s1729_s10 }
0x1660   :  { %v929_v8 = vpop.permute.xlu2 %928 }
0x1661   :  { %v931_v10 = vadd.f32 %v929_v8, %v921_v7 }
0x1663   :  { %1595 = vtanh.f32 %v931_v10  ;;  %939 = vrot.lane.b32.xlu2 %v931_v10, %s1730_s3 }
0x1669   :  { %v1596_v11 = vpop.eup %1595 }
0x166a   :  { %934 = vrot.lane.b32.xlu0 %v1596_v11, %s1728_s30 }
0x16bd   :  { %v940_v12 = vpop.permute.xlu2 %939 }
0x16be   :  { %942 = vst.msk [vmem:[#allocation5] sm:$0x3] %vm109_vm0, %v940_v12 }
0x16c5   :  { %v994_v15 = vld [vmem:[#allocation5] sm:$0x3] }
0x16dc   :  { %v935_v13 = vpop.permute.xlu0 %934 }
0x16dd   :  { %v937_v14 = vmul.f32 %v935_v13, %v913_v4 }
0x16df   :  { %944 = vrot.lane.b32.xlu1 %v937_v14, %s1729_s10  ;;  %v1104_v14 = vld [vmem:[#allocation2 + $0x8] sm:$0x3] }
0x16e7   :  { %996 = vrot.lane.b32.xlu1 %v994_v15, %s1729_s10 }
0x1751   :  { %v945_v16 = vpop.permute.xlu1 %944 }
0x1752   :  { %947 = vst.msk [vmem:[#allocation4] sm:$0x3] %vm109_vm0, %v945_v16 }
0x1759   :  { %v949_v17 = vld [vmem:[#allocation4] sm:$0x3]  ;;  %v997_v35 = vpop.permute.xlu1 %996 }
0x175a   :  { %1492 = vmatmul.msk.f32.vlgmr.msrb.gmra.mxu1 %vm114_vm2, %v949_v17 }
0x17d7   :  { %v970_v19 = vpop.f32.mrf.mxu1 }
0x17d8   :  { %v973_v21 = vadd.f32 %v970_v19, %v948_v18 }
0x17da   :  { %1597 = vtanh.f32 %v973_v21  ;;  %v1493_v23 = vmul.f32 -1.442695, %v973_v21 }
0x17dc   :  { %1599 = vpow2.f32 %v1493_v23 }
0x17e0   :  { %v1598_v22 = vpop.eup %1597 }
0x17e1   :  { %1001 = vrot.lane.b32.xlu0 %v1598_v22, %s1728_s30 }
0x17e2   :  { %v1600_v24 = vpop.eup %1599 }
0x17e3   :  { %v977_v9 = vadd.f32 1.0, %v1600_v24 }
0x17e5   :  { %1601 = vrcp.f32 %v977_v9  ;;  %v989_v29 = vand.u32 2147483648, %v977_v9  ;;  %vm983_vm3 = vweird.f32 %v977_v9  ;;  %v987_v30 = vand.u32 2147483647, %v977_v9 }
0x17e7   :  { %v990_v32 = vor.u32 1.1754944e-38, %v989_v29  ;;  %vm988_vm5 = vcmp.eq.f32.partialorder %v987_v30, 8.507059e+37 }
0x17eb   :  { %v1602_v25 = vpop.eup %1601 }
0x17ec   :  { %v979_v0 = vmul.f32 %v1602_v25, %v977_v9  ;;  %vm984_vm15 = vweird.f32 %v1602_v25 }
0x17ed   :  { %vm985_vm4 = vmor %vm983_vm3, %vm984_vm15 }
0x17ee   :  { %v980_v26 = vsub.f32 1.0, %v979_v0 }
0x17f0   :  { %v981_v27 = vmul.f32 %v1602_v25, %v980_v26 }
0x17f2   :  { %v982_v28 = vadd.f32 %v1602_v25, %v981_v27 }
0x17f4   :  { %v986_v31 = vsel %vm985_vm4, %v1602_v25, %v982_v28 }
0x17f5   :  { %v991_v33 = vsel %vm988_vm5, %v990_v32, %v986_v31 }
0x17f6   :  { %v999_v36 = vmul.f32 %v997_v35, %v991_v33 }
0x1853   :  { %v1002_v20 = vpop.permute.xlu0 %1001 }
0x1854   :  { %v1004_v34 = vmul.f32 %v1002_v20, %v991_v33 }
0x1856   :  { %1006 = vrot.lane.b32.xlu2 %v1004_v34, %s1729_s10 }
0x18b0   :  { %v1007_v37 = vpop.permute.xlu2 %1006 }
0x18b1   :  { %v1009_v38 = vadd.f32 %v1007_v37, %v999_v36 }
0x18b3   :  { %1603 = vtanh.f32 %v1009_v38  ;;  %1017 = vrot.lane.b32.xlu2 %v1009_v38, %s1730_s3 }
0x18b9   :  { %v1604_v39 = vpop.eup %1603 }
0x18ba   :  { %1012 = vrot.lane.b32.xlu0 %v1604_v39, %s1728_s30 }
0x190d   :  { %v1018_v40 = vpop.permute.xlu2 %1017 }
0x190e   :  { %1020 = vst.msk [vmem:[#allocation5] sm:$0x3] %vm109_vm0, %v1018_v40 }
0x1915   :  { %v1072_v43 = vld [vmem:[#allocation5] sm:$0x3] }
0x192c   :  { %v1013_v41 = vpop.permute.xlu0 %1012 }
0x192d   :  { %v1015_v42 = vmul.f32 %v1013_v41, %v991_v33 }
0x192f   :  { %1022 = vrot.lane.b32.xlu1 %v1015_v42, %s1729_s10  ;;  %v1182_v42 = vld [vmem:[#allocation2 + $0xa] sm:$0x3] }
0x1937   :  { %1074 = vrot.lane.b32.xlu1 %v1072_v43, %s1729_s10 }
0x19a1   :  { %v1023_v44 = vpop.permute.xlu1 %1022 }
0x19a2   :  { %1025 = vst.msk [vmem:[#allocation4] sm:$0x3] %vm109_vm0, %v1023_v44 }
0x19a9   :  { %v1027_v45 = vld [vmem:[#allocation4] sm:$0x3]  ;;  %v1075_v2 = vpop.permute.xlu1 %1074 }
0x19aa   :  { %1494 = vmatmul.msk.f32.vlgmr.msrb.gmra.mxu3 %vm114_vm2, %v1027_v45 }
0x1a2d   :  { %v1048_v47 = vpop.f32.mrf.mxu3 }
0x1a2e   :  { %v1051_v48 = vadd.f32 %v1048_v47, %v1026_v46 }
0x1a30   :  { %1605 = vtanh.f32 %v1051_v48  ;;  %v1495_v50 = vmul.f32 -1.442695, %v1051_v48 }
0x1a32   :  { %1607 = vpow2.f32 %v1495_v50 }
0x1a36   :  { %v1606_v49 = vpop.eup %1605 }
0x1a37   :  { %1079 = vrot.lane.b32.xlu0 %v1606_v49, %s1728_s30 }
0x1a38   :  { %v1608_v51 = vpop.eup %1607 }
0x1a39   :  { %v1055_v52 = vadd.f32 1.0, %v1608_v51 }
0x1a3b   :  { %1609 = vrcp.f32 %v1055_v52  ;;  %v1067_v58 = vand.u32 2147483648, %v1055_v52  ;;  %vm1061_vm6 = vweird.f32 %v1055_v52  ;;  %v1065_v59 = vand.u32 2147483647, %v1055_v52 }
0x1a3d   :  { %v1068_v61 = vor.u32 1.1754944e-38, %v1067_v58  ;;  %vm1066_vm8 = vcmp.eq.f32.partialorder %v1065_v59, 8.507059e+37 }
0x1a41   :  { %v1610_v53 = vpop.eup %1609 }
0x1a42   :  { %v1057_v54 = vmul.f32 %v1610_v53, %v1055_v52  ;;  %vm1062_vm1 = vweird.f32 %v1610_v53 }
0x1a43   :  { %vm1063_vm7 = vmor %vm1061_vm6, %vm1062_vm1 }
0x1a44   :  { %v1058_v55 = vsub.f32 1.0, %v1057_v54 }
0x1a46   :  { %v1059_v56 = vmul.f32 %v1610_v53, %v1058_v55 }
0x1a48   :  { %v1060_v57 = vadd.f32 %v1610_v53, %v1059_v56 }
0x1a4a   :  { %v1064_v60 = vsel %vm1063_vm7, %v1610_v53, %v1060_v57 }
0x1a4b   :  { %v1069_v63 = vsel %vm1066_vm8, %v1068_v61, %v1064_v60 }
0x1a4c   :  { %v1077_v3 = vmul.f32 %v1075_v2, %v1069_v63 }
0x1aa9   :  { %v1080_v62 = vpop.permute.xlu0 %1079 }
0x1aaa   :  { %v1082_v1 = vmul.f32 %v1080_v62, %v1069_v63 }
0x1aac   :  { %1084 = vrot.lane.b32.xlu2 %v1082_v1, %s1729_s10 }
0x1b06   :  { %v1085_v4 = vpop.permute.xlu2 %1084 }
0x1b07   :  { %v1087_v5 = vadd.f32 %v1085_v4, %v1077_v3 }
0x1b09   :  { %1611 = vtanh.f32 %v1087_v5  ;;  %1095 = vrot.lane.b32.xlu2 %v1087_v5, %s1730_s3 }
0x1b0f   :  { %v1612_v6 = vpop.eup %1611 }
0x1b10   :  { %1090 = vrot.lane.b32.xlu0 %v1612_v6, %s1728_s30 }
0x1b63   :  { %v1096_v7 = vpop.permute.xlu2 %1095 }
0x1b64   :  { %1098 = vst.msk [vmem:[#allocation5] sm:$0x3] %vm109_vm0, %v1096_v7 }
0x1b6b   :  { %v1150_v11 = vld [vmem:[#allocation5] sm:$0x3] }
0x1b82   :  { %v1091_v8 = vpop.permute.xlu0 %1090 }
0x1b83   :  { %v1093_v10 = vmul.f32 %v1091_v8, %v1069_v63 }
0x1b85   :  { %1100 = vrot.lane.b32.xlu1 %v1093_v10, %s1729_s10  ;;  %v1260_v10 = vld [vmem:[#allocation2 + $0xc] sm:$0x3] }
0x1b8d   :  { %1152 = vrot.lane.b32.xlu1 %v1150_v11, %s1729_s10 }
0x1bf7   :  { %v1101_v12 = vpop.permute.xlu1 %1100 }
0x1bf8   :  { %1103 = vst.msk [vmem:[#allocation4] sm:$0x3] %vm109_vm0, %v1101_v12 }
0x1bff   :  { %v1105_v13 = vld [vmem:[#allocation4] sm:$0x3]  ;;  %v1153_v32 = vpop.permute.xlu1 %1152 }
0x1c00   :  { %1496 = vmatmul.msk.f32.vlgmr.msrb.gmra.mxu0 %vm114_vm2, %v1105_v13 }
0x1c7d   :  { %v1126_v15 = vpop.f32.mrf.mxu0 }
0x1c7e   :  { %v1129_v16 = vadd.f32 %v1126_v15, %v1104_v14 }
0x1c80   :  { %1613 = vtanh.f32 %v1129_v16  ;;  %v1497_v18 = vmul.f32 -1.442695, %v1129_v16 }
0x1c82   :  { %1615 = vpow2.f32 %v1497_v18 }
0x1c86   :  { %v1614_v17 = vpop.eup %1613 }
0x1c87   :  { %1157 = vrot.lane.b32.xlu0 %v1614_v17, %s1728_s30 }
0x1c88   :  { %v1616_v19 = vpop.eup %1615 }
0x1c89   :  { %v1133_v21 = vadd.f32 1.0, %v1616_v19 }
0x1c8b   :  { %1617 = vrcp.f32 %v1133_v21  ;;  %v1145_v0 = vand.u32 2147483648, %v1133_v21  ;;  %vm1139_vm10 = vweird.f32 %v1133_v21  ;;  %v1143_v26 = vand.u32 2147483647, %v1133_v21 }
0x1c8d   :  { %v1146_v28 = vor.u32 1.1754944e-38, %v1145_v0  ;;  %vm1144_vm12 = vcmp.eq.f32.partialorder %v1143_v26, 8.507059e+37 }
0x1c91   :  { %v1618_v22 = vpop.eup %1617 }
0x1c92   :  { %v1135_v23 = vmul.f32 %v1618_v22, %v1133_v21  ;;  %vm1140_vm9 = vweird.f32 %v1618_v22 }
0x1c93   :  { %vm1141_vm11 = vmor %vm1139_vm10, %vm1140_vm9 }
0x1c94   :  { %v1136_v24 = vsub.f32 1.0, %v1135_v23 }
0x1c96   :  { %v1137_v9 = vmul.f32 %v1618_v22, %v1136_v24 }
0x1c98   :  { %v1138_v25 = vadd.f32 %v1618_v22, %v1137_v9 }
0x1c9a   :  { %v1142_v27 = vsel %vm1141_vm11, %v1618_v22, %v1138_v25  ;;  %vm1448_vm11 = vcmask 189440  }
0x1c9b   :  { %v1147_v30 = vsel %vm1144_vm12, %v1146_v28, %v1142_v27 }
0x1c9c   :  { %v1155_v20 = vmul.f32 %v1153_v32, %v1147_v30 }
0x1cf9   :  { %v1158_v29 = vpop.permute.xlu0 %1157 }
0x1cfa   :  { %v1160_v31 = vmul.f32 %v1158_v29, %v1147_v30 }
0x1cfc   :  { %1162 = vrot.lane.b32.xlu2 %v1160_v31, %s1729_s10 }
0x1d56   :  { %v1163_v33 = vpop.permute.xlu2 %1162 }
0x1d57   :  { %v1165_v34 = vadd.f32 %v1163_v33, %v1155_v20 }
0x1d59   :  { %1619 = vtanh.f32 %v1165_v34  ;;  %1173 = vrot.lane.b32.xlu2 %v1165_v34, %s1730_s3 }
0x1d5f   :  { %v1620_v35 = vpop.eup %1619 }
0x1d60   :  { %1168 = vrot.lane.b32.xlu0 %v1620_v35, %s1728_s30 }
0x1db3   :  { %v1174_v36 = vpop.permute.xlu2 %1173 }
0x1db4   :  { %1176 = vst.msk [vmem:[#allocation5] sm:$0x3] %vm109_vm0, %v1174_v36 }
0x1dbb   :  { %v1228_v39 = vld [vmem:[#allocation5] sm:$0x3] }
0x1dd2   :  { %v1169_v37 = vpop.permute.xlu0 %1168 }
0x1dd3   :  { %v1171_v38 = vmul.f32 %v1169_v37, %v1147_v30 }
0x1dd5   :  { %1178 = vrot.lane.b32.xlu1 %v1171_v38, %s1729_s10  ;;  %v1338_v38 = vld [vmem:[#allocation2 + $0xe] sm:$0x3] }
0x1ddd   :  { %1230 = vrot.lane.b32.xlu1 %v1228_v39, %s1729_s10 }
0x1e47   :  { %v1179_v40 = vpop.permute.xlu1 %1178 }
0x1e48   :  { %1181 = vst.msk [vmem:[#allocation4] sm:$0x3] %vm109_vm0, %v1179_v40 }
0x1e4f   :  { %v1183_v41 = vld [vmem:[#allocation4] sm:$0x3]  ;;  %v1231_v61 = vpop.permute.xlu1 %1230 }
0x1e50   :  { %1498 = vmatmul.msk.f32.vlgmr.msra.gmra.mxu1 %vm114_vm2, %v1183_v41 }
0x1ecd   :  { %v1204_v43 = vpop.f32.mrf.mxu1 }
0x1ece   :  { %v1207_v44 = vadd.f32 %v1204_v43, %v1182_v42 }
0x1ed0   :  { %1621 = vtanh.f32 %v1207_v44  ;;  %v1499_v46 = vmul.f32 -1.442695, %v1207_v44 }
0x1ed2   :  { %1623 = vpow2.f32 %v1499_v46 }
0x1ed6   :  { %v1622_v45 = vpop.eup %1621 }
0x1ed7   :  { %1235 = vrot.lane.b32.xlu0 %v1622_v45, %s1728_s30 }
0x1ed8   :  { %v1624_v47 = vpop.eup %1623 }
0x1ed9   :  { %v1211_v48 = vadd.f32 1.0, %v1624_v47 }
0x1edb   :  { %1625 = vrcp.f32 %v1211_v48  ;;  %v1223_v54 = vand.u32 2147483648, %v1211_v48  ;;  %vm1217_vm14 = vweird.f32 %v1211_v48  ;;  %v1221_v55 = vand.u32 2147483647, %v1211_v48 }
0x1edd   :  { %v1224_v57 = vor.u32 1.1754944e-38, %v1223_v54  ;;  %vm1222_vm3 = vcmp.eq.f32.partialorder %v1221_v55, 8.507059e+37 }
0x1ee1   :  { %v1626_v49 = vpop.eup %1625 }
0x1ee2   :  { %v1213_v50 = vmul.f32 %v1626_v49, %v1211_v48  ;;  %vm1218_vm13 = vweird.f32 %v1626_v49 }
0x1ee3   :  { %vm1219_vm15 = vmor %vm1217_vm14, %vm1218_vm13 }
0x1ee4   :  { %v1214_v51 = vsub.f32 1.0, %v1213_v50 }
0x1ee6   :  { %v1215_v52 = vmul.f32 %v1626_v49, %v1214_v51 }
0x1ee8   :  { %v1216_v53 = vadd.f32 %v1626_v49, %v1215_v52 }
0x1eea   :  { %v1220_v56 = vsel %vm1219_vm15, %v1626_v49, %v1216_v53 }
0x1eeb   :  { %v1225_v59 = vsel %vm1222_vm3, %v1224_v57, %v1220_v56 }
0x1eec   :  { %v1233_v62 = vmul.f32 %v1231_v61, %v1225_v59 }
0x1f49   :  { %v1236_v58 = vpop.permute.xlu0 %1235 }
0x1f4a   :  { %v1238_v60 = vmul.f32 %v1236_v58, %v1225_v59 }
0x1f4c   :  { %1240 = vrot.lane.b32.xlu2 %v1238_v60, %s1729_s10 }
0x1fa6   :  { %v1241_v63 = vpop.permute.xlu2 %1240 }
0x1fa7   :  { %v1243_v1 = vadd.f32 %v1241_v63, %v1233_v62 }
0x1fa9   :  { %1627 = vtanh.f32 %v1243_v1  ;;  %1251 = vrot.lane.b32.xlu2 %v1243_v1, %s1730_s3 }
0x1faf   :  { %v1628_v2 = vpop.eup %1627 }
0x1fb0   :  { %1246 = vrot.lane.b32.xlu0 %v1628_v2, %s1728_s30  ;;  %v1420_v2 = vld [vmem:[%s2022_s7 + $0x18] sm:$0xff] }
0x1fb1   :  { %1440 = vmatpush.msra.mxu0 %v1420_v2 }
0x2003   :  { %v1252_v3 = vpop.permute.xlu2 %1251 }
0x2004   :  { %1254 = vst.msk [vmem:[#allocation5] sm:$0x3] %vm109_vm0, %v1252_v3  ;;  %v1419_v3 = vld [vmem:[%s2022_s7 + $0x10] sm:$0xff] }
0x2005   :  { %1441 = vmatpush.msra.mxu0 %v1419_v3 }
0x200b   :  { %v1306_v6 = vld [vmem:[#allocation5] sm:$0x3] }
0x2022   :  { %v1247_v4 = vpop.permute.xlu0 %1246 }
0x2023   :  { %v1249_v5 = vmul.f32 %v1247_v4, %v1225_v59  ;;  %v1418_v4 = vld [vmem:[%s2022_s7 + $0x8] sm:$0xff] }
0x2024   :  { %1442 = vmatpush.msra.mxu0 %v1418_v4 }
0x2025   :  { %1256 = vrot.lane.b32.xlu1 %v1249_v5, %s1729_s10  ;;  %v1417_v5 = vld [vmem:[%s2022_s7] sm:$0xff] }
0x2026   :  { %1443 = vmatpush.msra.mxu0 %v1417_v5 }
0x202d   :  { %1308 = vrot.lane.b32.xlu1 %v1306_v6, %s1729_s10 }
0x2097   :  { %v1257_v7 = vpop.permute.xlu1 %1256 }
0x2098   :  { %1259 = vst.msk [vmem:[#allocation4] sm:$0x3] %vm109_vm0, %v1257_v7 }
0x209f   :  { %v1261_v8 = vld [vmem:[#allocation4] sm:$0x3]  ;;  %v1309_v28 = vpop.permute.xlu1 %1308 }
0x20a0   :  { %1500 = vmatmul.msk.f32.vlgmr.msrb.gmra.mxu2 %vm114_vm2, %v1261_v8  ;;  %v1516_v8 = vld [vmem:[%s2023_s8] ss:$0 sm:$0xff] }
0x2123   :  { %v1282_v11 = vpop.f32.mrf.mxu2 }
0x2124   :  { %v1285_v12 = vadd.f32 %v1282_v11, %v1260_v10 }
0x2126   :  { %1629 = vtanh.f32 %v1285_v12  ;;  %v1501_v14 = vmul.f32 -1.442695, %v1285_v12 }
0x2128   :  { %1631 = vpow2.f32 %v1501_v14 }
0x212c   :  { %v1630_v13 = vpop.eup %1629 }
0x212d   :  { %1313 = vrot.lane.b32.xlu0 %v1630_v13, %s1728_s30 }
0x212e   :  { %v1632_v15 = vpop.eup %1631 }
0x212f   :  { %v1289_v16 = vadd.f32 1.0, %v1632_v15 }
0x2131   :  { %1633 = vrcp.f32 %v1289_v16  ;;  %v1301_v23 = vand.u32 2147483648, %v1289_v16  ;;  %vm1295_vm5 = vweird.f32 %v1289_v16  ;;  %v1299_v24 = vand.u32 2147483647, %v1289_v16 }
0x2133   :  { %v1302_v25 = vor.u32 1.1754944e-38, %v1301_v23  ;;  %vm1300_vm6 = vcmp.eq.f32.partialorder %v1299_v24, 8.507059e+37 }
0x2137   :  { %v1634_v17 = vpop.eup %1633 }
0x2138   :  { %v1291_v18 = vmul.f32 %v1634_v17, %v1289_v16  ;;  %vm1296_vm4 = vweird.f32 %v1634_v17 }
0x2139   :  { %vm1297_vm1 = vmor %vm1295_vm5, %vm1296_vm4 }
0x213a   :  { %v1292_v19 = vsub.f32 1.0, %v1291_v18 }
0x213c   :  { %v1293_v21 = vmul.f32 %v1634_v17, %v1292_v19 }
0x213e   :  { %v1294_v22 = vadd.f32 %v1634_v17, %v1293_v21 }
0x2140   :  { %v1298_v9 = vsel %vm1297_vm1, %v1634_v17, %v1294_v22 }
0x2141   :  { %v1303_v26 = vsel %vm1300_vm6, %v1302_v25, %v1298_v9 }
0x2142   :  { %v1311_v29 = vmul.f32 %v1309_v28, %v1303_v26 }
0x219f   :  { %v1314_v0 = vpop.permute.xlu0 %1313 }
0x21a0   :  { %v1316_v27 = vmul.f32 %v1314_v0, %v1303_v26 }
0x21a2   :  { %1318 = vrot.lane.b32.xlu2 %v1316_v27, %s1729_s10 }
0x21fc   :  { %v1319_v30 = vpop.permute.xlu2 %1318 }
0x21fd   :  { %v1321_v31 = vadd.f32 %v1319_v30, %v1311_v29 }
0x21ff   :  { %1635 = vtanh.f32 %v1321_v31  ;;  %1329 = vrot.lane.b32.xlu2 %v1321_v31, %s1730_s3 }
0x2205   :  { %v1636_v32 = vpop.eup %1635 }
0x2206   :  { %1324 = vrot.lane.b32.xlu0 %v1636_v32, %s1728_s30 }
0x2259   :  { %v1330_v20 = vpop.permute.xlu2 %1329 }
0x225a   :  { %1332 = vst.msk [vmem:[#allocation5] sm:$0x3] %vm109_vm0, %v1330_v20 }
0x2261   :  { %v1384_v35 = vld [vmem:[#allocation5] sm:$0x3] }
0x2278   :  { %v1325_v33 = vpop.permute.xlu0 %1324 }
0x2279   :  { %v1327_v34 = vmul.f32 %v1325_v33, %v1303_v26 }
0x227b   :  { %1334 = vrot.lane.b32.xlu1 %v1327_v34, %s1729_s10 }
0x2283   :  { %1386 = vrot.lane.b32.xlu1 %v1384_v35, %s1729_s10 }
0x22ed   :  { %v1335_v36 = vpop.permute.xlu1 %1334 }
0x22ee   :  { %1337 = vst.msk [vmem:[#allocation4] sm:$0x3] %vm109_vm0, %v1335_v36 }
0x22f5   :  { %v1339_v37 = vld [vmem:[#allocation4] sm:$0x3]  ;;  %v1387_v57 = vpop.permute.xlu1 %1386 }
0x22f6   :  { %1502 = vmatmul.msk.f32.vlgmr.msra.gmra.mxu3 %vm114_vm2, %v1339_v37 }
0x2379   :  { %v1360_v39 = vpop.f32.mrf.mxu3 }
0x237a   :  { %v1363_v40 = vadd.f32 %v1360_v39, %v1338_v38 }
0x237c   :  { %1637 = vtanh.f32 %v1363_v40  ;;  %v1503_v42 = vmul.f32 -1.442695, %v1363_v40 }
0x237e   :  { %1639 = vpow2.f32 %v1503_v42 }
0x2382   :  { %v1638_v41 = vpop.eup %1637 }
0x2383   :  { %1391 = vrot.lane.b32.xlu0 %v1638_v41, %s1728_s30 }
0x2384   :  { %v1640_v43 = vpop.eup %1639 }
0x2385   :  { %v1367_v44 = vadd.f32 1.0, %v1640_v43 }
0x2387   :  { %1641 = vrcp.f32 %v1367_v44  ;;  %v1379_v50 = vand.u32 2147483648, %v1367_v44  ;;  %vm1373_vm8 = vweird.f32 %v1367_v44  ;;  %v1377_v51 = vand.u32 2147483647, %v1367_v44 }
0x2389   :  { %v1380_v53 = vor.u32 1.1754944e-38, %v1379_v50  ;;  %vm1378_vm10 = vcmp.eq.f32.partialorder %v1377_v51, 8.507059e+37 }
0x238d   :  { %v1642_v45 = vpop.eup %1641 }
0x238e   :  { %v1369_v46 = vmul.f32 %v1642_v45, %v1367_v44  ;;  %vm1374_vm7 = vweird.f32 %v1642_v45 }
0x238f   :  { %vm1375_vm9 = vmor %vm1373_vm8, %vm1374_vm7 }
0x2390   :  { %v1370_v47 = vsub.f32 1.0, %v1369_v46 }
0x2392   :  { %v1371_v48 = vmul.f32 %v1642_v45, %v1370_v47 }
0x2394   :  { %v1372_v49 = vadd.f32 %v1642_v45, %v1371_v48 }
0x2396   :  { %v1376_v52 = vsel %vm1375_vm9, %v1642_v45, %v1372_v49 }
0x2397   :  { %v1381_v55 = vsel %vm1378_vm10, %v1380_v53, %v1376_v52 }
0x2398   :  { %v1389_v58 = vmul.f32 %v1387_v57, %v1381_v55 }
0x23f5   :  { %v1392_v54 = vpop.permute.xlu0 %1391 }
0x23f6   :  { %v1394_v56 = vmul.f32 %v1392_v54, %v1381_v55 }
0x23f8   :  { %1396 = vrot.lane.b32.xlu2 %v1394_v56, %s1729_s10 }
0x2452   :  { %v1397_v59 = vpop.permute.xlu2 %1396 }
0x2453   :  { %v1399_v60 = vadd.f32 %v1397_v59, %v1389_v58 }
0x2455   :  { %1643 = vtanh.f32 %v1399_v60  ;;  %1407 = vrot.lane.b32.xlu2 %v1399_v60, %s1730_s3 }
0x245b   :  { %v1644_v61 = vpop.eup %1643 }
0x245c   :  { %1402 = vrot.lane.b32.xlu0 %v1644_v61, %s1728_s30 }
0x24af   :  { %v1408_v62 = vpop.permute.xlu2 %1407 }
0x24b0   :  { %1410 = vst.msk [vmem:[#allocation5] sm:$0x3] %vm109_vm0, %v1408_v62 }
0x24ce   :  { %v1403_v63 = vpop.permute.xlu0 %1402 }
0x24cf   :  { %v1405_v1 = vmul.f32 %v1403_v63, %v1381_v55 }
0x24d1   :  { %1412 = vrot.lane.b32.xlu1 %v1405_v1, %s1729_s10  ;;  %s1457_s10 = sshll.u32 %s2024_s9, 4  ;;  %s1458_s10 = int_to_ptr.hbm [resolvable:$true] %s1457_s10 }
0x2543   :  { %v1413_v6 = vpop.permute.xlu1 %1412 }
0x2544   :  { %1415 = vst.msk [vmem:[#allocation4] sm:$0x3] %vm109_vm0, %v1413_v6 }
0x254b   :  { %v1416_v7 = vld [vmem:[#allocation4] sm:$0x3] }
0x254c   :  { %1504 = vmatmul.msk.f32.vlgmr.msra.gmra.mxu0 %vm114_vm2, %v1416_v7 }
0x25c9   :  { %v1445_v10 = vpop.f32.mrf.mxu0 }
0x25ca   :  { %v1446_v11 = vadd.f32 %v1516_v8, %v1445_v10 }
0x25cc   :  { %1449 = vst.msk [vmem:[#allocation11] sm:$0x3] %vm1448_vm11, %v1446_v11 }
0x25cd   :  { %1460 = dma.vmem_to_hbm [thread:$0]  %s1456_s2, 32, %s1458_s10, [#allocation8]  }
0x25ce   :  { %1721 = dma.done.wait [#allocation8], 32  }
0x25cf   :  { %1722 = vsyncadd [#allocation8], 4294967264 }
0x25d0   :  { %1465 = vsyncpa [#allocation7], 1 }
0x25d1   :  { %1466 = vsyncpa [#allocation10], 1 }
0x25d2   :  { %1467 = vsyncpa [#allocation8], 1 }

</bundles_post_ra>
